<compile_context>
chip_gen: v7x
topology: tpu7x:2x2x1
jax: 0.10.0
libtpu: 0.0.40
codegen_flags: <defaults>
</compile_context>

<pallas_src>
import functools
import math

import jax
import jax.numpy as jnp
import numpy as np
from jax.experimental import pallas as pl
from jax.experimental.pallas import tpu as pltpu

TAO = 1.0                 # module: self.tao = 1
_PALLAS_MIN_ROWS = 512    # below this, custom-call launch latency dominates


# ---------------------------------------------------------------------------
# Small jnp helpers (also used by the pure reference and small-row fallbacks)
# ---------------------------------------------------------------------------
def _relu(z):
    return jnp.maximum(z, 0.0)


def _jnp_linear(x, w, b=None, act=False):
    y = x @ w
    if b is not None:
        y = y + b
    return _relu(y) if act else y


def _jnp_mlp2(x, p, act1=True, act2=True):
    hh = x @ p["w1"] + p["b1"]
    if act1:
        hh = _relu(hh)
    y = hh @ p["w2"] + p["b2"]
    if act2:
        y = _relu(y)
    return y


# ---------------------------------------------------------------------------
# Pallas kernels (all row-wise; rows are flattened batch/agent/edge indices)
# ---------------------------------------------------------------------------
def _linear_kernel(x_ref, w_ref, b_ref, o_ref, *, act):
    y = jnp.dot(x_ref[...].astype(w_ref.dtype), w_ref[...],
                preferred_element_type=jnp.float32)
    y = y + b_ref[...]
    if act:
        y = _relu(y)
    o_ref[...] = y.astype(o_ref.dtype)


def _mlp2_kernel(x_ref, w1_ref, b1_ref, w2_ref, b2_ref, o_ref, *, act1, act2):
    hh = jnp.dot(x_ref[...].astype(w1_ref.dtype), w1_ref[...],
                 preferred_element_type=jnp.float32)
    hh = hh + b1_ref[...]
    if act1:
        hh = _relu(hh)
    y = jnp.dot(hh.astype(w2_ref.dtype), w2_ref[...],
                preferred_element_type=jnp.float32)
    y = y + b2_ref[...]
    if act2:
        y = _relu(y)
    o_ref[...] = y.astype(o_ref.dtype)


def _edge_fused_kernel(rd_ref, eb_ref,
                       cw1_ref, cb1_ref, cw2_ref, cb2_ref,
                       ew1_ref, ew2_ref, eb2_ref,
                       cd_ref, ef_ref):
    """coord_mlp2 + edge_mlp fused over one tile of edge rows.

    rd_ref : (bm, 72)  raw pairwise distances
    eb_ref : (bm, nf)  precomputed h[i]@W1_h1 + h[j]@W1_h2 + b1 (edge_mlp layer-1 partial)
    cd_ref : (bm, 72)  coord_dist = coord_mlp2(raw_dist)              (output)
    ef_ref : (bm, nf)  edge_feat  = edge_mlp([h_i, h_j, coord_dist])  (output)
    """
    rd = rd_ref[...]
    # coord_mlp2: Linear(72 -> nf), ReLU, Linear(nf -> 72), ReLU
    t = jnp.dot(rd.astype(cw1_ref.dtype), cw1_ref[...],
                preferred_element_type=jnp.float32)
    t = _relu(t + cb1_ref[...])
    cd = jnp.dot(t.astype(cw2_ref.dtype), cw2_ref[...],
                 preferred_element_type=jnp.float32)
    cd = _relu(cd + cb2_ref[...])
    cd_ref[...] = cd.astype(cd_ref.dtype)
    # edge_mlp: only the coord_dist slice of W1 hits the MXU here (K = 72, not 136).
    t = jnp.dot(cd.astype(ew1_ref.dtype), ew1_ref[...],
                preferred_element_type=jnp.float32)
    t = _relu(t + eb_ref[...])
    ef = jnp.dot(t.astype(ew2_ref.dtype), ew2_ref[...],
                 preferred_element_type=jnp.float32)
    ef_ref[...] = _relu(ef + eb2_ref[...]).astype(ef_ref.dtype)


def _split_mlp_kernel(x_ref, eb_ref, w1_ref, w2_ref, b2_ref, o_ref, *,
                      act2, softmax):
    """MLP2 with split first layer: relu(x @ W1_tail + eb) @ W2 + b2 [relu][softmax]."""
    t = jnp.dot(x_ref[...].astype(w1_ref.dtype), w1_ref[...],
                preferred_element_type=jnp.float32)
    t = _relu(t + eb_ref[...])
    y = jnp.dot(t.astype(w2_ref.dtype), w2_ref[...],
                preferred_element_type=jnp.float32)
    y = y + b2_ref[...]
    if act2:
        y = _relu(y)
    if softmax:                               # fold softmax(logits / tao) in-kernel
        y = y * (1.0 / TAO)
        y = y - jnp.max(y, axis=-1, keepdims=True)
        e = jnp.exp(y)
        y = e / jnp.sum(e, axis=-1, keepdims=True)
    o_ref[...] = y.astype(o_ref.dtype)


# ---------------------------------------------------------------------------
# pallas_call wrappers (1-D row grid, weights resident)
# ---------------------------------------------------------------------------
def _cdiv(a, b):
    return (a + b - 1) // b


def _round_up(x, m):
    return _cdiv(x, m) * m


def _row_block(m, block_rows):
    """Largest row tile <= block_rows, multiple of 8; keep >= 2 grid steps when
    possible so the 'parallel' row axis can shard across both TCs on v7x."""
    bm = max(8, min(block_rows, _round_up(m, 8)))
    if _round_up(m, 8) >= 16 and _cdiv(m, bm) < 2:
        bm = max(8, _round_up(_cdiv(m, 2), 8))
    return bm


def _bcast(shape):
    # Grid-invariant operand (weights / biases stay VMEM resident).
    return pl.BlockSpec(tuple(shape), lambda i: (0,) * len(shape))


def _row_spec(bm, width):
    return pl.BlockSpec((bm, width), lambda i: (i, 0))


def _cparams():
    return pltpu.CompilerParams(
        dimension_semantics=("parallel",),     # shard row tiles across TCs (v7x)
        vmem_limit_bytes=32 * 1024 * 1024,     # explicit, safe on all generations
    )


def pallas_linear(x, w, b=None, *, act=False, block_rows=1024,
                  compute_dtype=jnp.float32):
    m, din = x.shape
    dout = w.shape[1]
    if b is None:
        b = jnp.zeros((1, dout), jnp.float32)
    bm = _row_block(m, block_rows)
    isz = np.dtype(compute_dtype).itemsize
    cost = pl.CostEstimate(
        flops=2 * m * din * dout, transcendentals=0,
        bytes_accessed=m * din * 4 + din * dout * isz + (dout + m * dout) * 4)
    return pl.pallas_call(
        functools.partial(_linear_kernel, act=act),
        out_shape=jax.ShapeDtypeStruct((m, dout), jnp.float32),
        grid_spec=pltpu.PrefetchScalarGridSpec(
            num_scalar_prefetch=0, grid=(_cdiv(m, bm),),
            in_specs=[_row_spec(bm, din), _bcast((din, dout)), _bcast((1, dout))],
            out_specs=_row_spec(bm, dout)),
        compiler_params=_cparams(), cost_estimate=cost,
    )(x, w.astype(compute_dtype), b.astype(jnp.float32))


def pallas_mlp2(x, w1, b1, w2, b2, *, act1=True, act2=True, block_rows=1024,
                compute_dtype=jnp.float32):
    m, din = x.shape
    dh, dout = w1.shape[1], w2.shape[1]
    bm = _row_block(m, block_rows)
    isz = np.dtype(compute_dtype).itemsize
    cost = pl.CostEstimate(
        flops=2 * m * (din * dh + dh * dout), transcendentals=0,
        bytes_accessed=m * din * 4 + (din * dh + dh * dout) * isz
        + (dh + dout + m * dout) * 4)
    return pl.pallas_call(
        functools.partial(_mlp2_kernel, act1=act1, act2=act2),
        out_shape=jax.ShapeDtypeStruct((m, dout), jnp.float32),
        grid_spec=pltpu.PrefetchScalarGridSpec(
            num_scalar_prefetch=0, grid=(_cdiv(m, bm),),
            in_specs=[_row_spec(bm, din),
                      _bcast((din, dh)), _bcast((1, dh)),
                      _bcast((dh, dout)), _bcast((1, dout))],
            out_specs=_row_spec(bm, dout)),
        compiler_params=_cparams(), cost_estimate=cost,
    )(x, w1.astype(compute_dtype), b1.astype(jnp.float32),
      w2.astype(compute_dtype), b2.astype(jnp.float32))


def pallas_edge_pipeline(rd_rows, ebias_rows, cmlp, ew1_cd, ew2, eb2, *,
                         block_rows=1024, compute_dtype=jnp.float32):
    """Fused coord_mlp2 + edge_mlp over flattened edge rows.

    Returns (coord_dist_rows [m, 72], edge_feat_rows [m, nf])."""
    m, C = rd_rows.shape
    dh_c = cmlp["w1"].shape[1]
    dh_e = ew1_cd.shape[1]
    nf_out = ew2.shape[1]
    bm = _row_block(m, block_rows)
    isz = np.dtype(compute_dtype).itemsize
    cdt = compute_dtype
    cost = pl.CostEstimate(
        flops=2 * m * (C * dh_c + dh_c * C + C * dh_e + dh_e * nf_out),
        transcendentals=0,
        bytes_accessed=m * (C + dh_e + C + nf_out) * 4
        + (C * dh_c + dh_c * C + C * dh_e + dh_e * nf_out) * isz)
    return pl.pallas_call(
        _edge_fused_kernel,
        out_shape=(jax.ShapeDtypeStruct((m, C), jnp.float32),
                   jax.ShapeDtypeStruct((m, nf_out), jnp.float32)),
        grid_spec=pltpu.PrefetchScalarGridSpec(
            num_scalar_prefetch=0, grid=(_cdiv(m, bm),),
            in_specs=[_row_spec(bm, C), _row_spec(bm, dh_e),
                      _bcast((C, dh_c)), _bcast((1, dh_c)),
                      _bcast((dh_c, C)), _bcast((1, C)),
                      _bcast((C, dh_e)), _bcast((dh_e, nf_out)),
                      _bcast((1, nf_out))],
            out_specs=(_row_spec(bm, C), _row_spec(bm, nf_out))),
        compiler_params=_cparams(), cost_estimate=cost,
    )(rd_rows, ebias_rows,
      cmlp["w1"].astype(cdt), cmlp["b1"].astype(jnp.float32),
      cmlp["w2"].astype(cdt), cmlp["b2"].astype(jnp.float32),
      ew1_cd.astype(cdt), ew2.astype(cdt), eb2.astype(jnp.float32))


def pallas_split_edge_mlp(x_rows, ebias_rows, w1_tail, w2, b2, *, act2=True,
                          softmax=False, block_rows=1024,
                          compute_dtype=jnp.float32):
    """Split-first-layer edge MLP (category_mlp / category_mlp2) over edge rows."""
    m, K = x_rows.shape
    dh = w1_tail.shape[1]
    dout = w2.shape[1]
    bm = _row_block(m, block_rows)
    isz = np.dtype(compute_dtype).itemsize
    cdt = compute_dtype
    cost = pl.CostEstimate(
        flops=2 * m * (K * dh + dh * dout),
        transcendentals=m * dout if softmax else 0,
        bytes_accessed=m * (K + dh + dout) * 4 + (K * dh + dh * dout) * isz)
    return pl.pallas_call(
        functools.partial(_split_mlp_kernel, act2=act2, softmax=softmax),
        out_shape=jax.ShapeDtypeStruct((m, dout), jnp.float32),
        grid_spec=pltpu.PrefetchScalarGridSpec(
            num_scalar_prefetch=0, grid=(_cdiv(m, bm),),
            in_specs=[_row_spec(bm, K), _row_spec(bm, dh),
                      _bcast((K, dh)), _bcast((dh, dout)), _bcast((1, dout))],
            out_specs=_row_spec(bm, dout)),
        compiler_params=_cparams(), cost_estimate=cost,
    )(x_rows, ebias_rows, w1_tail.astype(cdt), w2.astype(cdt),
      b2.astype(jnp.float32))


# ---------------------------------------------------------------------------
# Dispatchers: plain jnp for tiny row counts (launch latency > compute)
# ---------------------------------------------------------------------------
def dense(x2d, w, b=None, *, act=False, compute_dtype=jnp.float32,
          block_rows=1024):
    if x2d.shape[0] < _PALLAS_MIN_ROWS:
        return _jnp_linear(x2d, w, b, act)
    return pallas_linear(x2d, w, b, act=act, block_rows=block_rows,
                         compute_dtype=compute_dtype)


def dense_mlp2(x2d, p, *, act1=True, act2=True, compute_dtype=jnp.float32,
               block_rows=1024):
    if x2d.shape[0] < _PALLAS_MIN_ROWS:
        return _jnp_mlp2(x2d, p, act1, act2)
    return pallas_mlp2(x2d, p["w1"], p["b1"], p["w2"], p["b2"], act1=act1,
                       act2=act2, block_rows=block_rows,
                       compute_dtype=compute_dtype)


def _split_edge_bias(h2d, w1, b1, nf, B, N, *, compute_dtype=jnp.float32):
    """h[i]@W1[:nf] + h[j]@W1[nf:2nf] + b1 for every (i, j) edge, flattened.

    One small [B*N, 2*dh] matmul plus a cheap broadcast add; the per-edge
    partial is dh (=hidden_nf) wide instead of the 2nf+72-wide concat."""
    dh = w1.shape[1]
    w_pair = jnp.concatenate([w1[:nf], w1[nf:2 * nf]], axis=1)       # [nf, 2dh]
    hw = dense(h2d, w_pair, compute_dtype=compute_dtype)             # [B*N, 2dh]
    e_i = (hw[:, :dh] + b1).reshape(B, N, dh)
    e_j = hw[:, dh:].reshape(B, N, dh)
    return (e_i[:, :, None, :] + e_j[:, None, :, :]).reshape(B * N * N, dh)


# ---------------------------------------------------------------------------
# Feature_learning_layer forward (Pallas-backed)
# ---------------------------------------------------------------------------
@functools.partial(jax.jit, static_argnames=("block_rows", "compute_dtype"))
def feature_learning_forward(params, h, coord, vel, category, *,
                             block_rows=1024, compute_dtype=jnp.float32):
    """Returns (h, coord, category), mirroring Feature_learning_layer.forward."""
    B, N, nf = h.shape
    _, _, C, D = coord.shape
    kw = dict(block_rows=block_rows, compute_dtype=compute_dtype)
    h2d = h.reshape(B * N, nf)

    # coord += coord_vel(vel.transpose(2,3)).transpose(2,3)    (geometry: f32)
    vel_rows = jnp.swapaxes(vel, 2, 3).reshape(B * N * D, C)
    cv = dense(vel_rows, params["coord_vel"]["w"])
    coord = coord + jnp.swapaxes(cv.reshape(B, N, D, C), 2, 3)

    # ---- edge_model: fused coord_mlp2 + edge_mlp over B*N*N edge rows ----
    coord_diff = coord[:, :, None, :, :] - coord[:, None, :, :, :]   # [B,N,N,C,D]
    raw_dist = jnp.sqrt(jnp.sum(coord_diff * coord_diff, axis=-1))   # [B,N,N,C]
    e_w1 = params["edge_mlp"]["w1"]                                  # [2nf+C, nf]
    ebias = _split_edge_bias(h2d, e_w1, params["edge_mlp"]["b1"], nf, B, N,
                             compute_dtype=compute_dtype)
    cd_rows, ef_rows = pallas_edge_pipeline(
        raw_dist.reshape(B * N * N, C), ebias, params["coord_mlp2"],
        e_w1[2 * nf:], params["edge_mlp"]["w2"], params["edge_mlp"]["b2"], **kw)
    edge_feat = ef_rows.reshape(B, N, N, -1)

    # ---- TFE ----
    att = dense(h2d, params["mlp_q"]["w"], params["mlp_q"]["b"], act=True)
    att = att.reshape(B, N, C)[..., None]                            # [B,N,C,1]
    v = coord - jnp.mean(coord, axis=(1, 2), keepdims=True)
    coord = att * v + coord

    # ---- SFE ----
    if not params["category_mlp"]:
        # category_num == 2: factor_mlp input is all-zeros -> one constant row;
        # apply analytically instead of running a B*N*N-row MLP pass.
        fm = params["factor_mlp"]
        fconst = _relu(_relu(fm["b1"]) @ fm["w2"] + fm["b2"])        # [1, C]
        coord = coord + fconst[0][None, None, :, None] * jnp.sum(coord_diff, axis=2)
    else:
        rd_rows = raw_dist.reshape(B * N * N, C)
        factors = jnp.zeros((B, N, N, C), jnp.float32)
        for i, pc in enumerate(params["category_mlp"]):
            cb = _split_edge_bias(h2d, pc["w1"], pc["b1"], nf, B, N,
                                  compute_dtype=compute_dtype)
            fi = pallas_split_edge_mlp(rd_rows, cb, pc["w1"][2 * nf:],
                                       pc["w2"], pc["b2"], act2=True,
                                       softmax=False, **kw)
            factors = factors + category[..., i:i + 1] * fi.reshape(B, N, N, C)
        factors = dense_mlp2(factors.reshape(B * N * N, C),
                             params["factor_mlp"], **kw).reshape(B, N, N, C)
        coord = coord + jnp.sum(factors[..., None] * coord_diff, axis=2)

    # ---- non_linear (geometry: f32; layer_q / layer_k fused into one matmul) ----
    coord_mean = jnp.mean(coord, axis=(1, 2), keepdims=True)
    cc_rows = jnp.swapaxes(coord - coord_mean, 2, 3).reshape(B * N * D, C)
    wqk = jnp.concatenate([params["layer_q"]["w"], params["layer_k"]["w"]], axis=1)
    qk = dense(cc_rows, wqk)                                         # [B*N*D, 2C]
    q = jnp.swapaxes(qk[:, :C].reshape(B, N, D, C), 2, 3)
    k = jnp.swapaxes(qk[:, C:].reshape(B, N, D, C), 2, 3)
    product = jnp.sum(q * k, axis=-1, keepdims=True)                 # [B,N,C,1]
    mask = (product >= 0).astype(coord.dtype)
    k_norm_sq = jnp.sum(k * k, axis=-1, keepdims=True)
    coord = mask * q + (1.0 - mask) * (q - product / (k_norm_sq + 1e-4) * k)
    coord = coord + coord_mean

    # ---- FU (node feature update, recurrent) ----
    eye_mask = (1.0 - jnp.eye(N, dtype=edge_feat.dtype))[None, :, :, None]
    aggregated_edge = jnp.sum(eye_mask * edge_feat, axis=2)          # [B,N,nf]
    node_in = jnp.concatenate([h, aggregated_edge], axis=-1)
    node_out = dense_mlp2(node_in.reshape(B * N, 2 * nf), params["node_mlp"],
                          act1=True, act2=False, **kw)
    h_new = h + node_out.reshape(B, N, nf)

    # ---- category update (split first layer + fused softmax) ----
    c_w1 = params["category_mlp2"]["w1"]
    cbias = _split_edge_bias(h_new.reshape(B * N, nf), c_w1,
                             params["category_mlp2"]["b1"], nf, B, N,
                             compute_dtype=compute_dtype)
    probs = pallas_split_edge_mlp(cd_rows, cbias, c_w1[2 * nf:],
                                  params["category_mlp2"]["w2"],
                                  params["category_mlp2"]["b2"],
                                  act2=True, softmax=True, **kw)
    category = category + params["cat_w"] * probs.reshape(B, N, N, -1)
    return h_new, coord, category


# ---------------------------------------------------------------------------
# Pure-jnp reference (mirrors the PyTorch forward) + init
# ---------------------------------------------------------------------------
def feature_learning_reference(params, h, coord, vel, category):
    B, N, nf = h.shape
    _, _, C, D = coord.shape
    coord = coord + jnp.swapaxes(
        _jnp_linear(jnp.swapaxes(vel, 2, 3), params["coord_vel"]["w"]), 2, 3)
    coord_diff = coord[:, :, None, :, :] - coord[:, None, :, :, :]
    raw_dist = jnp.sqrt(jnp.sum(coord_diff * coord_diff, axis=-1))
    coord_dist = _jnp_mlp2(raw_dist, params["coord_mlp2"])
    h1 = jnp.broadcast_to(h[:, :, None, :], (B, N, N, nf))
    h2 = jnp.broadcast_to(h[:, None, :, :], (B, N, N, nf))
    edge_feat = _jnp_mlp2(jnp.concatenate([h1, h2, coord_dist], -1),
                          params["edge_mlp"])
    att = _jnp_linear(h, params["mlp_q"]["w"], params["mlp_q"]["b"], act=True)[..., None]
    v = coord - jnp.mean(coord, axis=(1, 2), keepdims=True)
    coord = att * v + coord
    factors = jnp.zeros((B, N, N, C), jnp.float32)
    if params["category_mlp"]:
        edge_h = jnp.concatenate([h1, h2, raw_dist], -1)
        for i, pc in enumerate(params["category_mlp"]):
            factors = factors + category[..., i:i + 1] * _jnp_mlp2(edge_h, pc)
    factors = _jnp_mlp2(factors, params["factor_mlp"])
    coord = coord + jnp.sum(factors[..., None] * coord_diff, axis=2)
    coord_mean = jnp.mean(coord, axis=(1, 2), keepdims=True)
    cc = coord - coord_mean
    q = jnp.swapaxes(_jnp_linear(jnp.swapaxes(cc, 2, 3), params["layer_q"]["w"]), 2, 3)
    k = jnp.swapaxes(_jnp_linear(jnp.swapaxes(cc, 2, 3), params["layer_k"]["w"]), 2, 3)
    product = jnp.sum(q * k, axis=-1, keepdims=True)
    mask = (product >= 0).astype(coord.dtype)
    k_norm_sq = jnp.sum(k * k, axis=-1, keepdims=True)
    coord = mask * q + (1.0 - mask) * (q - product / (k_norm_sq + 1e-4) * k) + coord_mean
    eye_mask = (1.0 - jnp.eye(N))[None, :, :, None]
    agg = jnp.sum(eye_mask * edge_feat, axis=2)
    h_new = h + _jnp_mlp2(jnp.concatenate([h, agg], -1), params["node_mlp"],
                          act1=True, act2=False)
    n1 = jnp.broadcast_to(h_new[:, :, None, :], (B, N, N, nf))
    n2 = jnp.broadcast_to(h_new[:, None, :, :], (B, N, N, nf))
    logits = _jnp_mlp2(jnp.concatenate([n1, n2, coord_dist], -1),
                       params["category_mlp2"])
    category = category + params["cat_w"] * jax.nn.softmax(logits / TAO, axis=-1)
    return h_new, coord, category


def _init_linear(key, fan_in, fan_out, bias=True):
    bound = 1.0 / math.sqrt(fan_in)
    kw_, kb_ = jax.random.split(key)
    p = {"w": jax.random.uniform(kw_, (fan_in, fan_out), jnp.float32, -bound, bound)}
    if bias:
        p["b"] = jax.random.uniform(kb_, (1, fan_out), jnp.float32, -bound, bound)
    return p


def _init_mlp2(key, din, dh, dout):
    k1, k2 = jax.random.split(key)
    l1 = _init_linear(k1, din, dh)
    l2 = _init_linear(k2, dh, dout)
    return {"w1": l1["w"], "b1": l1["b"], "w2": l2["w"], "b2": l2["b"]}


def init_params(key, nf, hidden_c=72, category_num=2):
    """input_nf = output_nf = hidden_nf = nf; hidden_c must be 72 (coord_mlp2 hardcoded)."""
    C = hidden_c
    keys = jax.random.split(key, 10)
    params = {
        "coord_vel": _init_linear(keys[0], C, C, bias=False),
        "coord_mlp2": _init_mlp2(keys[1], C, nf, C),
        "edge_mlp": _init_mlp2(keys[2], 2 * nf + C, nf, nf),
        "mlp_q": _init_linear(keys[3], nf, C),
        "factor_mlp": _init_mlp2(keys[4], C, C, C),
        "layer_q": _init_linear(keys[5], C, C, bias=False),
        "layer_k": _init_linear(keys[6], C, C, bias=False),
        "node_mlp": _init_mlp2(keys[7], 2 * nf, nf, nf),
        "category_mlp2": _init_mlp2(keys[8], 2 * nf + C, nf, category_num),
        "category_mlp": [],
        "cat_w": jnp.ones((1,), jnp.float32),
    }
    if category_num > 2:
        params["category_mlp"] = [
            _init_mlp2(k, 2 * nf + C, nf, C)
            for k in jax.random.split(keys[9], category_num - 2)
        ]
    return params


if __name__ == "__main__":
    key = jax.random.PRNGKey(0)
    # B batch, N agents, hidden_c=72 (fixed by module), D spatial, nf features.
    B, N, C, D, nf, cat_num = 2, 5, 72, 3, 32, 2

    key, kh, kc, kv, kcat, kp = jax.random.split(key, 6)
    h = jax.random.normal(kh, (B, N, nf), jnp.float32)
    coord = jax.random.normal(kc, (B, N, C, D), jnp.float32)
    vel = jax.random.normal(kv, (B, N, C, D), jnp.float32)
    category = jax.nn.softmax(
        jax.random.normal(kcat, (B, N, N, cat_num), jnp.float32), axis=-1)
    params = init_params(kp, nf, hidden_c=C, category_num=cat_num)

    # f32 path: strict check against the pure-jnp reference.
    h_out, coord_out, cat_out = feature_learning_forward(params, h, coord, vel, category)
    (h_out, coord_out, cat_out) = jax.block_until_ready((h_out, coord_out, cat_out))

    h_ref, coord_ref, cat_ref = feature_learning_reference(params, h, coord, vel, category)

    assert h_out.shape == (B, N, nf), h_out.shape
    assert coord_out.shape == (B, N, C, D), coord_out.shape
    assert cat_out.shape == (B, N, N, cat_num), cat_out.shape
    for got, ref in ((h_out, h_ref), (coord_out, coord_ref), (cat_out, cat_ref)):
        assert bool(jnp.allclose(got, ref, atol=2e-3, rtol=2e-3)), \
            float(jnp.max(jnp.abs(got - ref)))

    # bf16 operand streams for the edge/feature MLPs (f32 accumulation): smoke test.
    out_bf16 = feature_learning_forward(params, h, coord, vel, category,
                                        compute_dtype=jnp.bfloat16)
    out_bf16 = jax.block_until_ready(out_bf16)
    for got, ref in zip(out_bf16, (h_ref, coord_ref, cat_ref)):
        assert bool(jnp.all(jnp.isfinite(got)))
        assert bool(jnp.allclose(got, ref, atol=0.5, rtol=0.5))

    print("KERNEL_OK")
</pallas_src>

<mosaic_0001>
module attributes {stable_mosaic.version = 11 : i64} {
  func.func @_edge_fused_kernel(%arg0: i32, %arg1: memref<32x72xf32, #tpu.memory_space<vmem>>, %arg2: memref<32x32xf32, #tpu.memory_space<vmem>>, %arg3: memref<72x32xf32, #tpu.memory_space<vmem>>, %arg4: memref<1x32xf32, #tpu.memory_space<vmem>>, %arg5: memref<32x72xf32, #tpu.memory_space<vmem>>, %arg6: memref<1x72xf32, #tpu.memory_space<vmem>>, %arg7: memref<72x32xf32, #tpu.memory_space<vmem>>, %arg8: memref<32x32xf32, #tpu.memory_space<vmem>>, %arg9: memref<1x32xf32, #tpu.memory_space<vmem>>, %arg10: memref<32x72xf32, #tpu.memory_space<vmem>>, %arg11: memref<32x32xf32, #tpu.memory_space<vmem>>) attributes {dimension_semantics = [#tpu.dimension_semantics<parallel>], iteration_bounds = array<i64: 2>, scalar_prefetch = 0 : i64, scratch_operands = 0 : i64, tpu.core_type = #tpu.core_type<tc>, window_params = [{transform_indices = @transform_0, window_bounds = array<i64: 32, 72>}, {transform_indices = @transform_1, window_bounds = array<i64: 32, 32>}, {pipeline_mode = #tpu.pipeline_mode<synchronous>, transform_indices = @transform_2, window_bounds = array<i64: 72, 32>}, {pipeline_mode = #tpu.pipeline_mode<synchronous>, transform_indices = @transform_3, window_bounds = array<i64: 1, 32>}, {pipeline_mode = #tpu.pipeline_mode<synchronous>, transform_indices = @transform_4, window_bounds = array<i64: 32, 72>}, {pipeline_mode = #tpu.pipeline_mode<synchronous>, transform_indices = @transform_5, window_bounds = array<i64: 1, 72>}, {pipeline_mode = #tpu.pipeline_mode<synchronous>, transform_indices = @transform_6, window_bounds = array<i64: 72, 32>}, {pipeline_mode = #tpu.pipeline_mode<synchronous>, transform_indices = @transform_7, window_bounds = array<i64: 32, 32>}, {pipeline_mode = #tpu.pipeline_mode<synchronous>, transform_indices = @transform_8, window_bounds = array<i64: 1, 32>}, {transform_indices = @transform_9, window_bounds = array<i64: 32, 72>}, {transform_indices = @transform_10, window_bounds = array<i64: 32, 32>}]} {
    %c0 = arith.constant 0 : index
    %c0_0 = arith.constant 0 : index
    %0 = vector.load %arg1[%c0, %c0_0] : memref<32x72xf32, #tpu.memory_space<vmem>>, vector<32x72xf32>
    %c0_1 = arith.constant 0 : index
    %c0_2 = arith.constant 0 : index
    %1 = vector.load %arg3[%c0_1, %c0_2] : memref<72x32xf32, #tpu.memory_space<vmem>>, vector<72x32xf32>
    %cst = arith.constant dense<0.000000e+00> : vector<32x32xf32>
    %2 = tpu.matmul %0, %1, %cst {dimension_numbers = #tpu.dot_dimension_numbers<[1], [0], [0], [1], [0, 0, 1, 1], [], []>} : vector<32x72xf32>, vector<72x32xf32>, vector<32x32xf32> -> vector<32x32xf32>
    %c0_3 = arith.constant 0 : index
    %c0_4 = arith.constant 0 : index
    %3 = vector.load %arg4[%c0_3, %c0_4] : memref<1x32xf32, #tpu.memory_space<vmem>>, vector<1x32xf32>
    %4 = vector.broadcast %3 : vector<1x32xf32> to vector<32x32xf32>
    %5 = arith.addf %2, %4 : vector<32x32xf32>
    %cst_5 = arith.constant 0.000000e+00 : f32
    %6 = vector.broadcast %cst_5 : f32 to vector<32x32xf32>
    %7 = arith.maximumf %5, %6 : vector<32x32xf32>
    %c0_6 = arith.constant 0 : index
    %c0_7 = arith.constant 0 : index
    %8 = vector.load %arg5[%c0_6, %c0_7] : memref<32x72xf32, #tpu.memory_space<vmem>>, vector<32x72xf32>
    %cst_8 = arith.constant dense<0.000000e+00> : vector<32x72xf32>
    %9 = tpu.matmul %7, %8, %cst_8 {dimension_numbers = #tpu.dot_dimension_numbers<[1], [0], [0], [1], [0, 0, 1, 1], [], []>} : vector<32x32xf32>, vector<32x72xf32>, vector<32x72xf32> -> vector<32x72xf32>
    %c0_9 = arith.constant 0 : index
    %c0_10 = arith.constant 0 : index
    %10 = vector.load %arg6[%c0_9, %c0_10] : memref<1x72xf32, #tpu.memory_space<vmem>>, vector<1x72xf32>
    %11 = vector.broadcast %10 : vector<1x72xf32> to vector<32x72xf32>
    %12 = arith.addf %9, %11 : vector<32x72xf32>
    %cst_11 = arith.constant 0.000000e+00 : f32
    %13 = vector.broadcast %cst_11 : f32 to vector<32x72xf32>
    %14 = arith.maximumf %12, %13 : vector<32x72xf32>
    %c0_12 = arith.constant 0 : index
    %c0_13 = arith.constant 0 : index
    %15 = vector.load %arg10[%c0_12, %c0_13] : memref<32x72xf32, #tpu.memory_space<vmem>>, vector<32x72xf32>
    tpu.vector_store %arg10[%c0_12, %c0_13], %14 {strides = array<i32>} : memref<32x72xf32, #tpu.memory_space<vmem>>, vector<32x72xf32>,
    %c0_14 = arith.constant 0 : index
    %c0_15 = arith.constant 0 : index
    %16 = vector.load %arg7[%c0_14, %c0_15] : memref<72x32xf32, #tpu.memory_space<vmem>>, vector<72x32xf32>
    %cst_16 = arith.constant dense<0.000000e+00> : vector<32x32xf32>
    %17 = tpu.matmul %14, %16, %cst_16 {dimension_numbers = #tpu.dot_dimension_numbers<[1], [0], [0], [1], [0, 0, 1, 1], [], []>} : vector<32x72xf32>, vector<72x32xf32>, vector<32x32xf32> -> vector<32x32xf32>
    %c0_17 = arith.constant 0 : index
    %c0_18 = arith.constant 0 : index
    %18 = vector.load %arg2[%c0_17, %c0_18] : memref<32x32xf32, #tpu.memory_space<vmem>>, vector<32x32xf32>
    %19 = arith.addf %17, %18 : vector<32x32xf32>
    %cst_19 = arith.constant 0.000000e+00 : f32
    %20 = vector.broadcast %cst_19 : f32 to vector<32x32xf32>
    %21 = arith.maximumf %19, %20 : vector<32x32xf32>
    %c0_20 = arith.constant 0 : index
    %c0_21 = arith.constant 0 : index
    %22 = vector.load %arg8[%c0_20, %c0_21] : memref<32x32xf32, #tpu.memory_space<vmem>>, vector<32x32xf32>
    %cst_22 = arith.constant dense<0.000000e+00> : vector<32x32xf32>
    %23 = tpu.matmul %21, %22, %cst_22 {dimension_numbers = #tpu.dot_dimension_numbers<[1], [0], [0], [1], [0, 0, 1, 1], [], []>} : vector<32x32xf32>, vector<32x32xf32>, vector<32x32xf32> -> vector<32x32xf32>
    %c0_23 = arith.constant 0 : index
    %c0_24 = arith.constant 0 : index
    %24 = vector.load %arg9[%c0_23, %c0_24] : memref<1x32xf32, #tpu.memory_space<vmem>>, vector<1x32xf32>
    %25 = vector.broadcast %24 : vector<1x32xf32> to vector<32x32xf32>
    %26 = arith.addf %23, %25 : vector<32x32xf32>
    %cst_25 = arith.constant 0.000000e+00 : f32
    %27 = vector.broadcast %cst_25 : f32 to vector<32x32xf32>
    %28 = arith.maximumf %26, %27 : vector<32x32xf32>
    %c0_26 = arith.constant 0 : index
    %c0_27 = arith.constant 0 : index
    %29 = vector.load %arg11[%c0_26, %c0_27] : memref<32x32xf32, #tpu.memory_space<vmem>>, vector<32x32xf32>
    tpu.vector_store %arg11[%c0_26, %c0_27], %28 {strides = array<i32>} : memref<32x32xf32, #tpu.memory_space<vmem>>, vector<32x32xf32>,
    return
  }
  func.func @transform_0(%arg0: i32) -> (i32, i32) {
    %c0_i32 = arith.constant 0 : i32
    %c0_i32_0 = arith.constant 0 : i32
    return %arg0, %c0_i32 : i32, i32
  }
  func.func @transform_1(%arg0: i32) -> (i32, i32) {
    %c0_i32 = arith.constant 0 : i32
    %c0_i32_0 = arith.constant 0 : i32
    return %arg0, %c0_i32 : i32, i32
  }
  func.func @transform_2(%arg0: i32) -> (i32, i32) {
    %c0_i32 = arith.constant 0 : i32
    %c0_i32_0 = arith.constant 0 : i32
    %c0_i32_1 = arith.constant 0 : i32
    return %c0_i32, %c0_i32_0 : i32, i32
  }
  func.func @transform_3(%arg0: i32) -> (i32, i32) {
    %c0_i32 = arith.constant 0 : i32
    %c0_i32_0 = arith.constant 0 : i32
    %c0_i32_1 = arith.constant 0 : i32
    return %c0_i32, %c0_i32_0 : i32, i32
  }
  func.func @transform_4(%arg0: i32) -> (i32, i32) {
    %c0_i32 = arith.constant 0 : i32
    %c0_i32_0 = arith.constant 0 : i32
    %c0_i32_1 = arith.constant 0 : i32
    return %c0_i32, %c0_i32_0 : i32, i32
  }
  func.func @transform_5(%arg0: i32) -> (i32, i32) {
    %c0_i32 = arith.constant 0 : i32
    %c0_i32_0 = arith.constant 0 : i32
    %c0_i32_1 = arith.constant 0 : i32
    return %c0_i32, %c0_i32_0 : i32, i32
  }
  func.func @transform_6(%arg0: i32) -> (i32, i32) {
    %c0_i32 = arith.constant 0 : i32
    %c0_i32_0 = arith.constant 0 : i32
    %c0_i32_1 = arith.constant 0 : i32
    return %c0_i32, %c0_i32_0 : i32, i32
  }
  func.func @transform_7(%arg0: i32) -> (i32, i32) {
    %c0_i32 = arith.constant 0 : i32
    %c0_i32_0 = arith.constant 0 : i32
    %c0_i32_1 = arith.constant 0 : i32
    return %c0_i32, %c0_i32_0 : i32, i32
  }
  func.func @transform_8(%arg0: i32) -> (i32, i32) {
    %c0_i32 = arith.constant 0 : i32
    %c0_i32_0 = arith.constant 0 : i32
    %c0_i32_1 = arith.constant 0 : i32
    return %c0_i32, %c0_i32_0 : i32, i32
  }
  func.func @transform_9(%arg0: i32) -> (i32, i32) {
    %c0_i32 = arith.constant 0 : i32
    %c0_i32_0 = arith.constant 0 : i32
    return %arg0, %c0_i32 : i32, i32
  }
  func.func @transform_10(%arg0: i32) -> (i32, i32) {
    %c0_i32 = arith.constant 0 : i32
    %c0_i32_0 = arith.constant 0 : i32
    return %arg0, %c0_i32 : i32, i32
  }
}

module attributes {stable_mosaic.version = 11 : i64} {
  func.func @_split_mlp_kernel(%arg0: i32, %arg1: memref<32x72xf32, #tpu.memory_space<vmem>>, %arg2: memref<32x32xf32, #tpu.memory_space<vmem>>, %arg3: memref<72x32xf32, #tpu.memory_space<vmem>>, %arg4: memref<32x2xf32, #tpu.memory_space<vmem>>, %arg5: memref<1x2xf32, #tpu.memory_space<vmem>>, %arg6: memref<32x2xf32, #tpu.memory_space<vmem>>) attributes {dimension_semantics = [#tpu.dimension_semantics<parallel>], iteration_bounds = array<i64: 2>, scalar_prefetch = 0 : i64, scratch_operands = 0 : i64, tpu.core_type = #tpu.core_type<tc>, window_params = [{transform_indices = @transform_0, window_bounds = array<i64: 32, 72>}, {transform_indices = @transform_1, window_bounds = array<i64: 32, 32>}, {pipeline_mode = #tpu.pipeline_mode<synchronous>, transform_indices = @transform_2, window_bounds = array<i64: 72, 32>}, {pipeline_mode = #tpu.pipeline_mode<synchronous>, transform_indices = @transform_3, window_bounds = array<i64: 32, 2>}, {pipeline_mode = #tpu.pipeline_mode<synchronous>, transform_indices = @transform_4, window_bounds = array<i64: 1, 2>}, {transform_indices = @transform_5, window_bounds = array<i64: 32, 2>}]} {
    %c0 = arith.constant 0 : index
    %c0_0 = arith.constant 0 : index
    %0 = vector.load %arg1[%c0, %c0_0] : memref<32x72xf32, #tpu.memory_space<vmem>>, vector<32x72xf32>
    %c0_1 = arith.constant 0 : index
    %c0_2 = arith.constant 0 : index
    %1 = vector.load %arg3[%c0_1, %c0_2] : memref<72x32xf32, #tpu.memory_space<vmem>>, vector<72x32xf32>
    %cst = arith.constant dense<0.000000e+00> : vector<32x32xf32>
    %2 = tpu.matmul %0, %1, %cst {dimension_numbers = #tpu.dot_dimension_numbers<[1], [0], [0], [1], [0, 0, 1, 1], [], []>} : vector<32x72xf32>, vector<72x32xf32>, vector<32x32xf32> -> vector<32x32xf32>
    %c0_3 = arith.constant 0 : index
    %c0_4 = arith.constant 0 : index
    %3 = vector.load %arg2[%c0_3, %c0_4] : memref<32x32xf32, #tpu.memory_space<vmem>>, vector<32x32xf32>
    %4 = arith.addf %2, %3 : vector<32x32xf32>
    %cst_5 = arith.constant 0.000000e+00 : f32
    %5 = vector.broadcast %cst_5 : f32 to vector<32x32xf32>
    %6 = arith.maximumf %4, %5 : vector<32x32xf32>
    %c0_6 = arith.constant 0 : index
    %c0_7 = arith.constant 0 : index
    %7 = vector.load %arg4[%c0_6, %c0_7] : memref<32x2xf32, #tpu.memory_space<vmem>>, vector<32x2xf32>
    %cst_8 = arith.constant dense<0.000000e+00> : vector<32x2xf32>
    %8 = tpu.matmul %6, %7, %cst_8 {dimension_numbers = #tpu.dot_dimension_numbers<[1], [0], [0], [1], [0, 0, 1, 1], [], []>} : vector<32x32xf32>, vector<32x2xf32>, vector<32x2xf32> -> vector<32x2xf32>
    %c0_9 = arith.constant 0 : index
    %c0_10 = arith.constant 0 : index
    %9 = vector.load %arg5[%c0_9, %c0_10] : memref<1x2xf32, #tpu.memory_space<vmem>>, vector<1x2xf32>
    %10 = vector.broadcast %9 : vector<1x2xf32> to vector<32x2xf32>
    %11 = arith.addf %8, %10 : vector<32x2xf32>
    %cst_11 = arith.constant 0.000000e+00 : f32
    %12 = vector.broadcast %cst_11 : f32 to vector<32x2xf32>
    %13 = arith.maximumf %11, %12 : vector<32x2xf32>
    %cst_12 = arith.constant 1.000000e+00 : f32
    %14 = vector.broadcast %cst_12 : f32 to vector<32x2xf32>
    %15 = arith.mulf %13, %14 : vector<32x2xf32>
    %cst_13 = arith.constant dense<0xFF800000> : vector<32xf32>
    %16 = vector.multi_reduction <maximumf>, %15, %cst_13 [1] : vector<32x2xf32> to vector<32xf32>
    %17 = vector.shape_cast %16 : vector<32xf32> to vector<32x1xf32>
    %18 = vector.broadcast %17 : vector<32x1xf32> to vector<32x2xf32>
    %19 = arith.subf %15, %18 : vector<32x2xf32>
    %20 = math.exp %19 : vector<32x2xf32>
    %cst_14 = arith.constant dense<0.000000e+00> : vector<32xf32>
    %21 = vector.multi_reduction <add>, %20, %cst_14 [1] : vector<32x2xf32> to vector<32xf32>
    %22 = vector.shape_cast %21 : vector<32xf32> to vector<32x1xf32>
    %23 = vector.broadcast %22 : vector<32x1xf32> to vector<32x2xf32>
    %24 = arith.divf %20, %23 : vector<32x2xf32>
    %c0_15 = arith.constant 0 : index
    %c0_16 = arith.constant 0 : index
    %25 = vector.load %arg6[%c0_15, %c0_16] : memref<32x2xf32, #tpu.memory_space<vmem>>, vector<32x2xf32>
    tpu.vector_store %arg6[%c0_15, %c0_16], %24 {strides = array<i32>} : memref<32x2xf32, #tpu.memory_space<vmem>>, vector<32x2xf32>,
    return
  }
  func.func @transform_0(%arg0: i32) -> (i32, i32) {
    %c0_i32 = arith.constant 0 : i32
    %c0_i32_0 = arith.constant 0 : i32
    return %arg0, %c0_i32 : i32, i32
  }
  func.func @transform_1(%arg0: i32) -> (i32, i32) {
    %c0_i32 = arith.constant 0 : i32
    %c0_i32_0 = arith.constant 0 : i32
    return %arg0, %c0_i32 : i32, i32
  }
  func.func @transform_2(%arg0: i32) -> (i32, i32) {
    %c0_i32 = arith.constant 0 : i32
    %c0_i32_0 = arith.constant 0 : i32
    %c0_i32_1 = arith.constant 0 : i32
    return %c0_i32, %c0_i32_0 : i32, i32
  }
  func.func @transform_3(%arg0: i32) -> (i32, i32) {
    %c0_i32 = arith.constant 0 : i32
    %c0_i32_0 = arith.constant 0 : i32
    %c0_i32_1 = arith.constant 0 : i32
    return %c0_i32, %c0_i32_0 : i32, i32
  }
  func.func @transform_4(%arg0: i32) -> (i32, i32) {
    %c0_i32 = arith.constant 0 : i32
    %c0_i32_0 = arith.constant 0 : i32
    %c0_i32_1 = arith.constant 0 : i32
    return %c0_i32, %c0_i32_0 : i32, i32
  }
  func.func @transform_5(%arg0: i32) -> (i32, i32) {
    %c0_i32 = arith.constant 0 : i32
    %c0_i32_0 = arith.constant 0 : i32
    return %arg0, %c0_i32 : i32, i32
  }
}

</mosaic_0001>

<bundles_post_ra>
// kernel: mul.33
= control target key start
LH: loop header
LB: loop body
LE: loop exit
PB: predicated region body
PF: predicated region fallthrough
CT: control target
= control target key end

     0   :  { %vm3_vm0 = vcmask 588800   ;;  %s40_s0 = inlined_call_operand.vmem [shape: f32[10,72], index: 0, kind: input, shape index: {}]   ;;  %s41_s1 = inlined_call_operand.vmem [shape: f32[2,5,72], index: 1, kind: output, shape index: {}]  }
   0x1   :  { %v2_v0 = vld [vmem:[%s40_s0] sm:$0xff]   ;;  %v13_v1 = vld [vmem:[%s40_s0 + $0x8] sm:$0x3]  }
   0x2   :  { %4 = vst.msk [vmem:[%s41_s1] sm:$0x1f] %vm3_vm0, %v2_v0   ;;  %12 = vst.msk [vmem:[%s41_s1 + $0x3] sm:$0xe0] %vm3_vm0, %v2_v0  }
   0x3   :  { %14 = vst.msk [vmem:[%s41_s1 + $0xb] sm:$0x3] %vm3_vm0, %v13_v1  }

// kernel: feature_learning_forward.3
= control target key start
LH: loop header
LB: loop body
LE: loop exit
PB: predicated region body
PF: predicated region fallthrough
CT: control target
= control target key end

     0   :  { %s1151_s18 = smov 0   ;;  %s1153_s19 = smov 0   ;;  %s1319_s0 = inlined_call_operand.vmem [shape: f32[50,72], index: 0, kind: input, shape index: {}]   ;;  %s1320_s1 = inlined_call_operand.vmem [shape: f32[50,32], index: 1, kind: input, shape index: {}]   ;;  %s1321_s2 = inlined_call_operand.vmem [shape: f32[72,32], index: 2, kind: input, shape index: {}]   ;;  %s1322_s3 = inlined_call_operand.vmem [shape: f32[32,2], index: 3, kind: input, shape index: {}]   ;;  %s1323_s4 = inlined_call_operand.vmem [shape: f32[1,2], index: 4, kind: input, shape index: {}]   ;;  %s1324_s5 = inlined_call_operand.vmem [shape: f32[50,2], index: 5, kind: output, shape index: {}]  }
   0x1   :  { %s1155_s20 = smov 0  }
   0x2 LB: > { %s1164_s21 = sadd.s32 4294967295, %s1087_s20   ;;  %s1166_s22 = sadd.s32 1, %s1087_s20   ;;  %s1087_s20 = sphi %s1155_s20, %s1331_s20   ;;  %s1083_s19 = sphi %s1153_s19, %s1330_s19   ;;  %s1079_s18 = sphi %s1151_s18, %s1329_s18  }
   0x3   : > { %s134_s23 = ssub.s32 %s1087_s20, %s1166_s22  ;;  %s137_s24 = sadd.s32 1, %s1083_s19 }
   0x4   : > { %p135_p0 = scmp.eq.s32.totalorder %s134_s23, 0  ;;  %p147_p1 = scmp.ne.s32.totalorder %s1083_s19, %s1079_s18 }
   0x5   : > { %p148_p2 = scmp.eq.s32.totalorder %s1164_s21, 1  ;;  %p811_p3 = scmp.ge.s32.totalorder %s1087_s20, 1 }
   0x6   : > { %s1174_s25 = scalar_select %p135_p0, %s1083_s19, %s137_s24  }
   0x7   : > { %p1176_p4 = por %p148_p2, %p147_p1  ;;  %p215_p5 = scmp.lt.s32.totalorder %s1087_s20, 3 }
   0x9   : > { %p216_p6 = pnand %p811_p3, %p215_p5 }
   0xa   : > { %v292_v0 = vld [vmem:[%s1321_s2] sm:$0xff] (!%p216_p6)  ;;  %v293_v1 = vld [vmem:[%s1321_s2 + $0x8] sm:$0xff] (!%p216_p6)  ;;  %v294_v2 = vld [vmem:[%s1321_s2 + $0x10] sm:$0xff] (!%p216_p6)  ;;  %s1190_s8 = sshll.u32 (!%p216_p6), %s1164_s21, 2  ;;  %vm305_vm0 = vcmask (!%p216_p6), 588800   ;;  %vm418_vm1 = vcmask (!%p216_p6), 261120  }
   0xb   : > { %219 = sbr.rel (%p216_p6) target bundleno = 839 (0x347), region = 40  ;;  %v905_v3 = vpack.c.bf16 (!%p216_p6), %v293_v1, %v292_v0  ;;  %v295_v4 = vld [vmem:[%s1321_s2 + $0x18] sm:$0xff] (!%p216_p6)  ;;  %p260_p7 = scmp.lt.s32.totalorder (!%p216_p6), %s1190_s8, 6  ;;  %v296_v6 = vld [vmem:[%s1321_s2 + $0x20] sm:$0xff] (!%p216_p6)  ;;  %v297_v7 = vld [vmem:[%s1321_s2 + $0x28] sm:$0xff] (!%p216_p6)  ;;  %vm520_vm2 = vcmask (!%p216_p6), 15360  }
   0xc   : > { %v909_v5 = vpack.c.bf16 (!%p216_p6), %v295_v4, %v294_v2  ;;  %v407_v8 = vld [vmem:[%s1322_s3] sm:$0xff] (!%p216_p6)  ;;  %v408_v9 = vld [vmem:[%s1322_s3 + $0x8] sm:$0xff] (!%p216_p6)  ;;  %v913_v11 = vpack.c.bf16 (!%p216_p6), %v297_v7, %v296_v6  ;;  %v298_v12 = vld [vmem:[%s1321_s2 + $0x30] sm:$0xff] (!%p216_p6)  ;;  %s252_s27 = sand.u32 (!%p216_p6), 1, %s1079_s18  }
   0xd   : > { %906 = vmatprep.subr.bf16.mxu0 (!%p216_p6), %v905_v3  ;;  %v921_v10 = vpack.c.bf16 (!%p216_p6), %v408_v9, %v407_v8  ;;  %v299_v13 = vld [vmem:[%s1321_s2 + $0x38] sm:$0xff] (!%p216_p6)  ;;  %v300_v16 = vld [vmem:[%s1321_s2 + $0x40] sm:$0xff] (!%p216_p6)  ;;  %v409_v20 = vld [vmem:[%s1322_s3 + $0x10] sm:$0xff] (!%p216_p6)  ;;  %s812_s28 = sshll.u32 (!%p216_p6), %s252_s27, 5 }
   0xe   : > { %908 = vmatpush3.bf16.msra.mxu0 (!%p216_p6), %v905_v3  ;;  %v917_v15 = vpack.c.bf16 (!%p216_p6), %v299_v13, %v298_v12  ;;  %v410_v21 = vld [vmem:[%s1322_s3 + $0x18] sm:$0xff] (!%p216_p6)  ;;  %v821_v39 = vld [vmem:[%s1323_s4] ss:$0 sm:$0xff] (!%p216_p6)  ;;  %s1253_s29 = scalar_lea.vmem (!%p216_p6), [#allocation2], %s812_s28  }
   0xf   : > { %910 = vmatprep.subr.bf16.mxu0 (!%p216_p6), %v909_v5  ;;  %922 = vmatprep.subr.bf16.mxu1 (!%p216_p6), %v921_v10  ;;  %v925_v22 = vpack.c.bf16 (!%p216_p6), %v410_v21, %v409_v20 }
  0x10   : > { %924 = vmatpush3.bf16.msra.mxu1 (!%p216_p6), %v921_v10 }
  0x11   : > { %926 = vmatprep.subr.bf16.mxu1 (!%p216_p6), %v925_v22 }
  0x12   : > { %s1203_s15 = scalar_select %p260_p7, %s1190_s8, 6  ;;  %912 = vmatpush3.bf16.msra.mxu0 %v909_v5 }
  0x13   : > { %914 = vmatprep.subr.bf16.mxu0 %v913_v11  ;;  %s577_s18 = ssub.s32 (%p1176_p4), 7, %s1190_s8  ;;  %s843_s30 = sshll.u32 (%p1176_p4), %s1164_s21, 5 }
  0x14   : > { %s814_s24 = sshll.u32 %s1203_s15, 3  ;;  %928 = vmatpush3.bf16.msra.mxu1 %v925_v22  ;;  %p578_p8 = scmp.lt.s32.totalorder (%p1176_p4), %s577_s18, 4 }
  0x15   : > { %s263_s9 = scalar_lea.vmem %s1319_s0, %s814_s24  ;;  %s277_s23 = scalar_lea.vmem %s1320_s1, %s814_s24 }
  0x16   : > { %v288_v14 = vld [vmem:[%s263_s9] sm:$0xff]  ;;  %916 = vmatpush3.bf16.msra.mxu0 %v913_v11  ;;  %v289_v17 = vld [vmem:[%s263_s9 + $0x8] sm:$0xff]  ;;  %v290_v18 = vld [vmem:[%s263_s9 + $0x10] sm:$0xff] }
  0x17   : > { %885 = vmatprep.mubr.msk.f32.mxu0 %vm305_vm0, %v288_v14  ;;  %918 = vmatprep.subr.bf16.mxu0 %v917_v15  ;;  %v291_v19 = vld [vmem:[%s263_s9 + $0x18] sm:$0xff]  ;;  %v302_v23 = vld [vmem:[%s277_s23 + $0x8] sm:$0xff]  ;;  %v301_v24 = vld [vmem:[%s277_s23] sm:$0xff]  ;;  %s1270_s9 = scalar_lea.vmem (%p1176_p4), %s1324_s5, %s843_s30  }
  0x18   : > { %v304_v29 = vld [vmem:[%s277_s23 + $0x18] sm:$0xff]  ;;  %v303_v30 = vld [vmem:[%s277_s23 + $0x10] sm:$0xff] }
  0x1a   : > { %920 = vmatpush3.bf16.msra.mxu0 %v917_v15 }
  0x1b   : > { %883 = vmatprep.subr.mxu0 %v300_v16 }
  0x1e   : > { %884 = vmatpush3.msra.mxu0 %v300_v16 }
  0x1f   : > { %886 = vmatmul.mubr.msk.f32.vlgmr.msra.gmra.mrb[0].mxu0 %vm305_vm0, %v289_v17 }
  0x20   : > { %888 = vmatprep.mubr.msk.f32.mxu0 %vm305_vm0, %v290_v18 }
  0x23   : > { %889 = vmatmul.mubr.msk.f32.gmra.mrb[2].mxu0 %vm305_vm0, %v291_v19 }
  0xf2   : > { %v887_v25 = vpop.f32.mrb[0].mxu0 }
  0xf3   : > { %v390_v26 = vadd.f32 %v887_v25, %v302_v23  ;;  %v384_v27 = vpop.f32.mrb[1].mxu0 }
  0xf4   : > { %v385_v28 = vadd.f32 %v384_v27, %v301_v24 }
  0xf5   : > { %v404_v33 = vmax.f32 %v390_v26, 0.0 }
  0xf6   : > { %v403_v31 = vmax.f32 %v385_v28, 0.0  ;;  %v890_v32 = vpop.f32.mrb[2].mxu0 }
  0xf7   : > { %v400_v34 = vadd.f32 %v890_v32, %v304_v29  ;;  %v394_v35 = vpop.f32.mrb[3].mxu0 }
  0xf8   : > { %v395_v36 = vadd.f32 %v394_v35, %v303_v30  ;;  %899 = vmatprep.mubr.msk.f32.mxu1 %vm418_vm1, %v403_v31 }
  0xf9   : > { %900 = vmatmul.mubr.msk.f32.vlgmr.msra.gmra.mrb[0].mxu1 %vm418_vm1, %v404_v33  ;;  %v406_v38 = vmax.f32 %v400_v34, 0.0 }
  0xfa   : > { %v405_v37 = vmax.f32 %v395_v36, 0.0 }
  0xfc   : > { %902 = vmatprep.mubr.msk.f32.mxu1 %vm418_vm1, %v405_v37 }
  0xfd   : > { %903 = vmatmul.mubr.msk.f32.gmra.mrb[2].mxu1 %vm418_vm1, %v406_v38 }
 0x1cc   : > { %v901_v40 = vpop.f32.mrb[0].mxu1 }
 0x1cd   : > { %v497_v41 = vpop.f32.mrb[1].mxu1  ;;  %v503_v42 = vadd.f32 %v901_v40, %v821_v39 }
 0x1ce   : > { %v498_v43 = vadd.f32 %v821_v39, %v497_v41 }
 0x1cf   : > { %v517_v47 = vmax.f32 %v503_v42, 0.0 }
 0x1d0   : > { %v516_v44 = vmax.f32 %v498_v43, 0.0  ;;  %v904_v45 = vpop.f32.mrb[2].mxu1 }
 0x1d1   : > { %v507_v46 = vpop.f32.mrb[3].mxu1  ;;  %v513_v48 = vadd.f32 %v904_v45, %v821_v39  ;;  %v524_v54 = vsel %vm520_vm2, %v517_v47, -inf }
 0x1d2   : > { %v508_v49 = vadd.f32 %v821_v39, %v507_v46  ;;  %v521_v50 = vsel %vm520_vm2, %v516_v44, -inf }
 0x1d3   : > { %522 = vmax.xlane.f32.xlu0 %v521_v50  ;;  %v519_v52 = vmax.f32 %v513_v48, 0.0 }
 0x1d4   : > { %v518_v51 = vmax.f32 %v508_v49, 0.0 }
 0x1d5   : > { %v530_v55 = vsel %vm520_vm2, %v519_v52, -inf }
 0x1d6   : > { %v527_v53 = vsel %vm520_vm2, %v518_v51, -inf }
 0x1d7   : > { %528 = vmax.xlane.f32.xlu1 %v527_v53  ;;  %525 = vmax.xlane.f32.xlu0 %v524_v54 }
 0x1db   : > { %531 = vmax.xlane.f32.xlu1 %v530_v55 }
 0x260   : > { %v523_v56 = vpop.xlane.xlu0 %522 }
 0x261   : > { %v533_v57 = vsub.f32 %v516_v44, %v523_v56 }
 0x263   : > { %v537_v58 = vmul.f32 1.442695, %v533_v57 }
 0x264   : > { %v529_v59 = vpop.xlane.xlu1 %528  ;;  %v526_v60 = vpop.xlane.xlu0 %525 }
 0x265   : > { %1017 = vpow2.f32 %v537_v58  ;;  %v535_v61 = vsub.f32 %v518_v51, %v529_v59  ;;  %v534_v62 = vsub.f32 %v517_v47, %v526_v60 }
 0x267   : > { %v541_v63 = vmul.f32 1.442695, %v535_v61  ;;  %v539_v0 = vmul.f32 1.442695, %v534_v62 }
 0x268   : > { %v532_v1 = vpop.xlane.xlu1 %531 }
 0x269   : > { %1019 = vpow2.f32 %v541_v63  ;;  %v536_v2 = vsub.f32 %v519_v52, %v532_v1 }
 0x26a   : > { %1021 = vpow2.f32 %v539_v0 }
 0x26b   : > { %v543_v3 = vmul.f32 1.442695, %v536_v2 }
 0x26d   : > { %1023 = vpow2.f32 %v543_v3 }
 0x26f   : > { %v1018_v4 = vpop.eup %1017 }
 0x270   : > { %v545_v5 = vsel %vm520_vm2, %v1018_v4, 0.0 }
 0x271   : > { %546 = vadd.xlane.f32.xlu0 %v545_v5 }
 0x273   : > { %v1020_v6 = vpop.eup %1019 }
 0x274   : > { %v1022_v7 = vpop.eup %1021  ;;  %v551_v8 = vsel %vm520_vm2, %v1020_v6, 0.0 }
 0x275   : > { %552 = vadd.xlane.f32.xlu0 %v551_v8  ;;  %v548_v9 = vsel %vm520_vm2, %v1022_v7, 0.0 }
 0x276   : > { %549 = vadd.xlane.f32.xlu1 %v548_v9 }
 0x277   : > { %v1024_v10 = vpop.eup %1023 }
 0x278   : > { %v554_v11 = vsel %vm520_vm2, %v1024_v10, 0.0 }
 0x27a   : > { %555 = vadd.xlane.f32.xlu1 %v554_v11 }
 0x2fe   : > { %v547_v12 = vpop.xlane.xlu0 %546 }
 0x2ff   : > { %1025 = vrcp.f32 %v547_v12 }
 0x302   : > { %v553_v13 = vpop.xlane.xlu0 %552 }
 0x303   : > { %v550_v14 = vpop.xlane.xlu1 %549  ;;  %1027 = vrcp.f32 %v553_v13 }
 0x304   : > { %1029 = vrcp.f32 %v550_v14 }
 0x307   : > { %v556_v15 = vpop.xlane.xlu1 %555 }
 0x308   : > { %1031 = vrcp.f32 %v556_v15 }
 0x309   : > { %v1026_v16 = vpop.eup %1025 }
 0x30a   : > { %v558_v17 = vmul.f32 %v1026_v16, %v1018_v4 }
 0x30c   : > { %565 = vst.msk [vmem:[%s1253_s29] sm:$0xff] %vm520_vm2, %v558_v17 }
 0x30d   : > { %v1028_v18 = vpop.eup %1027 }
 0x30e   : > { %v1030_v19 = vpop.eup %1029  ;;  %v562_v20 = vmul.f32 %v1028_v18, %v1020_v6 }
 0x30f   : > { %v560_v21 = vmul.f32 %v1030_v19, %v1022_v7  ;;  %575 = sbr.rel (!%p1176_p4) target bundleno = 839 (0x347), region = 44 }
 0x310   : > { %567 = vst.msk [vmem:[%s1253_s29 + $0x10] sm:$0xff] %vm520_vm2, %v562_v20 }
 0x311   : > { %566 = vst.msk [vmem:[%s1253_s29 + $0x8] sm:$0xff] %vm520_vm2, %v560_v21 }
 0x312   : > { %v1032_v22 = vpop.eup %1031 }
 0x313   : > { %v564_v23 = vmul.f32 %v1032_v22, %v1024_v10 }
 0x315   : > { %568 = vst.msk [vmem:[%s1253_s29 + $0x18] sm:$0xff] %vm520_vm2, %v564_v23 }
 0x316   : > { %s1333_s18 = smov (!%p578_p8, %s577_s18), 4 }
 0x317   : > { %s828_s10 = sshll.u32 %s1333_s18, 7 }
 0x318   : > { %p831_p9 = scmp.eq.s32.totalorder %s828_s10, 0 }
 0x319   : > { %s1276_s11 = sshrl.u32 (!%p831_p9), %s1333_s18, 2 }
 0x31a   : > { %586 = sbr.rel (%p831_p9) target bundleno = 839 (0x347), region = 48  ;;  %p832_p10 = scmp.le.s32.totalorder (!%p831_p9), %s1276_s11, 0 }
 0x321   : > { %758 = sbr.rel (%p832_p10) target bundleno = 818 (0x332), region = 127  ;;  %s1326_s21 = smov (!%p832_p10), %s1270_s9 }
 0x322   : > { %s1327_s26 = smov (!%p832_p10), %s1253_s29  ;;  %s1285_s8 = smov (!%p832_p10), 0  }
 0x323   : > { %s1101_s12 = smov (!%p832_p10), 0  }
 0x328 LB: >> { %v654_v24 = vld [vmem:[%s1095_s26] sm:$0xff]  ;;  %v656_v25 = vld [vmem:[%s1095_s26 + $0x8] sm:$0xff]  ;;  %v658_v26 = vld [vmem:[%s1095_s26 + $0x10] sm:$0xff]  ;;  %s662_s13 = sadd.s32 1, %s1099_s8  ;;  %s648_s12 = sadd.s32 1, %s1103_s12   ;;  %s1103_s12 = sphi %s1101_s12, %s648_s12   ;;  %s1099_s8 = sphi %s1285_s8, %s1328_s8   ;;  %s1095_s26 = sphi %s1327_s26, %s667_s26   ;;  %s1091_s21 = sphi %s1326_s21, %s668_s21  }
 0x329   : >> { %655 = vst [vmem:[%s1091_s21] sm:$0xff] %v654_v24  ;;  %657 = vst [vmem:[%s1091_s21 + $0x8] sm:$0xff] %v656_v25  ;;  %v660_v27 = vld [vmem:[%s1095_s26 + $0x18] sm:$0xff]  ;;  %p663_p11 = scmp.ge.s32.totalorder %s662_s13, %s1276_s11  ;;  %p647_p12 = scmp.ge.s32.totalorder %s648_s12, %s1276_s11 }
 0x32a   : >> { %659 = vst [vmem:[%s1091_s21 + $0x10] sm:$0xff] %v658_v26  ;;  %661 = vst [vmem:[%s1091_s21 + $0x18] sm:$0xff] %v660_v27 }
 0x32b   : >> { %s1335_s13 = smov (%p663_p11, %s662_s13), 0  ;;  %650 = sbr.rel (!%p647_p12) target bundleno = 808 (0x328), region = 133 }
 0x32c   : >> { %s833_s14 = sshll.u32 %s1335_s13, 5  ;;  %s1328_s8 = smov %s1335_s13 }
 0x32d   : >> { %s667_s26 = scalar_lea.vmem %s1253_s29, %s833_s14 [#allocation2]   ;;  %s668_s21 = scalar_lea.vmem %s1270_s9, %s833_s14  }
 0x332 PF: > { %s1301_s16 = sand.u32 3, %s1333_s18   ;;  %s844_s17 = sshll.u32 %s1276_s11, 5 }
 0x333   : > { %s673_s20 = scalar_lea.vmem %s1253_s29, %s844_s17 [#allocation2]   ;;  %s675_s23 = scalar_lea.vmem %s1270_s9, %s844_s17  }
 0x334   : > { %p838_p13 = scmp.le.s32.totalorder %s1301_s16, 0 }
 0x335   : > { %s1105_s15 = smov (!%p838_p13), %s675_s23   ;;  %s1109_s24 = smov (!%p838_p13), %s673_s20  }
 0x336   : > { %772 = sbr.rel (%p838_p13) target bundleno = 839 (0x347), region = 138  ;;  %s1113_s27 = smov (!%p838_p13), 0  }
 0x337   : > { %s1117_s28 = smov (!%p838_p13), 0  }
 0x33d LB: >> { %v685_v28 = vld [vmem:[%s1111_s24] sm:$0xff]  ;;  %s687_s18 = sadd.s32 1, %s1115_s27  ;;  %s679_s28 = sadd.s32 1, %s1119_s28   ;;  %s1119_s28 = sphi %s1117_s28, %s679_s28   ;;  %s1115_s27 = sphi %s1113_s27, %s1114_s27   ;;  %s1111_s24 = sphi %s1109_s24, %s692_s24   ;;  %s1107_s15 = sphi %s1105_s15, %s693_s15  }
 0x33e   : >> { %686 = vst [vmem:[%s1107_s15] sm:$0xff] %v685_v28  ;;  %p688_p0 = scmp.ge.s32.totalorder %s687_s18, %s1301_s16  ;;  %p678_p1 = scmp.ge.s32.totalorder %s679_s28, %s1301_s16 }
 0x340   : >> { %s1337_s18 = smov (%p688_p0, %s687_s18), 0  ;;  %681 = sbr.rel (!%p678_p1) target bundleno = 829 (0x33d), region = 144 }
 0x341   : >> { %s839_s29 = sshll.u32 %s1337_s18, 3  ;;  %s1114_s27 = smov %s1337_s18  }
 0x342   : >> { %s692_s24 = scalar_lea.vmem %s673_s20, %s839_s29 [#allocation2]   ;;  %s693_s15 = scalar_lea.vmem %s675_s23, %s839_s29  }
 0x347 PF: > { %p12_p2 = scmp.ge.s32.totalorder %s1166_s22, 4   ;;  %s1329_s18 = smov %s1083_s19 }
 0x348   : > { %s1330_s19 = smov %s1174_s25  ;;  %s1331_s20 = smov %s1166_s22 }
 0x349   :  { %14 = sbr.rel (!%p12_p2) target bundleno = 2 (0x2), region = 155 }

// kernel: feature_learning_forward.2
= control target key start
LH: loop header
LB: loop body
LE: loop exit
PB: predicated region body
PF: predicated region fallthrough
CT: control target
= control target key end

     0   :  { %s2216_s0 = inlined_call_operand.vmem [shape: f32[50,72], index: 0, kind: input, shape index: {}]   ;;  %s2217_s1 = inlined_call_operand.vmem [shape: f32[50,32], index: 1, kind: input, shape index: {}]   ;;  %s2218_s2 = inlined_call_operand.vmem [shape: f32[72,32], index: 2, kind: input, shape index: {}]   ;;  %s2219_s3 = inlined_call_operand.vmem [shape: f32[1,32], index: 3, kind: input, shape index: {}]   ;;  %s2220_s4 = inlined_call_operand.vmem [shape: f32[32,72], index: 4, kind: input, shape index: {}]   ;;  %s2221_s5 = inlined_call_operand.vmem [shape: f32[1,72], index: 5, kind: input, shape index: {}]   ;;  %s2222_s6 = inlined_call_operand.vmem [shape: f32[72,32], index: 6, kind: input, shape index: {}]   ;;  %s2223_s7 = inlined_call_operand.vmem [shape: f32[32,32], index: 7, kind: input, shape index: {}]   ;;  %s2224_s8 = inlined_call_operand.vmem [shape: f32[1,32], index: 8, kind: input, shape index: {}]   ;;  %s2225_s9 = inlined_call_operand.vmem [shape: f32[50,72], index: 9, kind: output, shape index: {0}]   ;;  %s2226_s10 = inlined_call_operand.vmem [shape: f32[50,32], index: 10, kind: output, shape index: {1}]  }
   0x1   :  { %2227 = sst [smem:[#allocation4_spill]] %s2216_s0 }
   0x2   :  { %2228 = sst [smem:[#allocation5_spill]] %s2217_s1 }
   0x3   :  { %2229 = sst [smem:[#allocation6_spill]] %s2218_s2 }
   0x4   :  { %s1939_s13 = smov 0   ;;  %s1941_s14 = smov 0  }
   0x5   :  { %s1943_s15 = smov 0  }
   0x6 LB: > { %s1952_s16 = sadd.s32 4294967295, %s1818_s15   ;;  %s1954_s17 = sadd.s32 1, %s1818_s15   ;;  %s1818_s15 = sphi %s1943_s15, %s2242_s15   ;;  %s1814_s14 = sphi %s1941_s14, %s2241_s14   ;;  %s1810_s13 = sphi %s1939_s13, %s2240_s13  }
   0x7   : > { %s224_s18 = ssub.s32 %s1818_s15, %s1954_s17  ;;  %s227_s19 = sadd.s32 1, %s1814_s14 }
   0x8   : > { %p225_p0 = scmp.eq.s32.totalorder %s224_s18, 0  ;;  %p237_p1 = scmp.ne.s32.totalorder %s1814_s14, %s1810_s13 }
   0x9   : > { %p238_p2 = scmp.eq.s32.totalorder %s1952_s16, 1  ;;  %p1350_p3 = scmp.ge.s32.totalorder %s1818_s15, 1 }
   0xa   : > { %s1962_s20 = scalar_select %p225_p0, %s1814_s14, %s227_s19  }
   0xb   : > { %p1964_p4 = por %p238_p2, %p237_p1  ;;  %p343_p5 = scmp.lt.s32.totalorder %s1818_s15, 3 }
   0xd   : > { %p344_p6 = pnand %p1350_p3, %p343_p5 }
   0xe   : > { %s2231_s2 = sld [smem:[#allocation6_spill]] (!%p344_p6)  ;;  %s1978_s28 = sshll.u32 (!%p344_p6), %s1952_s16, 2  ;;  %v557_v8 = vld [vmem:[%s2220_s4] sm:$0xff] (!%p344_p6)  ;;  %v558_v9 = vld [vmem:[%s2220_s4 + $0x8] sm:$0xff] (!%p344_p6)  ;;  %vm455_vm0 = vcmask (!%p344_p6), 588800   ;;  %v559_v20 = vld [vmem:[%s2220_s4 + $0x10] sm:$0xff] (!%p344_p6) }
   0xf   : > { %347 = sbr.rel (%p344_p6) target bundleno = 1022 (0x3fe), region = 56  ;;  %p402_p7 = scmp.lt.s32.totalorder (!%p344_p6), %s1978_s28, 6  ;;  %v1548_v10 = vpack.c.bf16 (!%p344_p6), %v558_v9, %v557_v8  ;;  %v560_v21 = vld [vmem:[%s2220_s4 + $0x18] sm:$0xff] (!%p344_p6)  ;;  %v674_v23 = vld [vmem:[%s2222_s6] sm:$0xff] (!%p344_p6)  ;;  %v675_v24 = vld [vmem:[%s2222_s6 + $0x8] sm:$0xff] (!%p344_p6)  ;;  %vm568_vm1 = vcmask (!%p344_p6), 261120  }
  0x10   : > { %s2232_s0 = sld [smem:[#allocation4_spill]] (!%p344_p6)  ;;  %v1552_v22 = vpack.c.bf16 (!%p344_p6), %v560_v21, %v559_v20  ;;  %v1556_v25 = vpack.c.bf16 (!%p344_p6), %v675_v24, %v674_v23  ;;  %v1357_v26 = vld [vmem:[%s2219_s3] ss:$0 sm:$0xff] (!%p344_p6)  ;;  %v676_v31 = vld [vmem:[%s2222_s6 + $0x10] sm:$0xff] (!%p344_p6)  ;;  %v677_v32 = vld [vmem:[%s2222_s6 + $0x18] sm:$0xff] (!%p344_p6)  ;;  %s388_s12 = sand.u32 (!%p344_p6), 1, %s1810_s13  }
  0x11   : > { %1549 = vmatprep.subr.bf16.mxu1 (!%p344_p6), %v1548_v10  ;;  %v1560_v38 = vpack.c.bf16 (!%p344_p6), %v677_v32, %v676_v31  ;;  %v678_v40 = vld [vmem:[%s2222_s6 + $0x20] sm:$0xff] (!%p344_p6)  ;;  %v679_v41 = vld [vmem:[%s2222_s6 + $0x28] sm:$0xff] (!%p344_p6)  ;;  %v680_v45 = vld [vmem:[%s2222_s6 + $0x30] sm:$0xff] (!%p344_p6)  ;;  %s2068_s22 = sshll.u32 (!%p344_p6), %s388_s12, 5  ;;  %s2233_s1 = sld [smem:[#allocation5_spill]] (!%p344_p6) }
  0x12   : > { %1551 = vmatpush3.bf16.msra.mxu1 (!%p344_p6), %v1548_v10  ;;  %v1564_v44 = vpack.c.bf16 (!%p344_p6), %v679_v41, %v678_v40  ;;  %v681_v46 = vld [vmem:[%s2222_s6 + $0x38] sm:$0xff] (!%p344_p6)  ;;  %v682_v48 = vld [vmem:[%s2222_s6 + $0x40] sm:$0xff] (!%p344_p6)  ;;  %v789_v50 = vld [vmem:[%s2223_s7 + $0x8] sm:$0xff] (!%p344_p6)  ;;  %s2071_s23 = scalar_lea.vmem (!%p344_p6), [#allocation2], %s2068_s22   ;;  %s2104_s12 = scalar_lea.vmem (!%p344_p6), [#allocation3], %s2068_s22  }
  0x13   : > { %1553 = vmatprep.subr.bf16.mxu1 (!%p344_p6), %v1552_v22  ;;  %v1568_v47 = vpack.c.bf16 (!%p344_p6), %v681_v46, %v680_v45  ;;  %v788_v49 = vld [vmem:[%s2223_s7] sm:$0xff] (!%p344_p6) }
  0x14   : > { %v439_v0 = vld [vmem:[%s2231_s2] sm:$0xff] (!%p344_p6)  ;;  %v440_v1 = vld [vmem:[%s2231_s2 + $0x8] sm:$0xff] (!%p344_p6)  ;;  %v441_v2 = vld [vmem:[%s2231_s2 + $0x10] sm:$0xff] (!%p344_p6)  ;;  %v1572_v51 = vpack.c.bf16 (!%p344_p6), %v789_v50, %v788_v49 }
  0x15   : > { %v1532_v3 = vpack.c.bf16 (!%p344_p6), %v440_v1, %v439_v0  ;;  %v442_v4 = vld [vmem:[%s2231_s2 + $0x18] sm:$0xff] (!%p344_p6)  ;;  %v443_v6 = vld [vmem:[%s2231_s2 + $0x20] sm:$0xff] (!%p344_p6)  ;;  %v444_v7 = vld [vmem:[%s2231_s2 + $0x28] sm:$0xff] (!%p344_p6) }
  0x16   : > { %v1536_v5 = vpack.c.bf16 %v442_v4, %v441_v2  ;;  %s1991_s19 = scalar_select %p402_p7, %s1978_s28, 6  ;;  %v1540_v11 = vpack.c.bf16 %v444_v7, %v443_v6  ;;  %v445_v12 = vld [vmem:[%s2231_s2 + $0x30] sm:$0xff]  ;;  %v446_v13 = vld [vmem:[%s2231_s2 + $0x38] sm:$0xff]  ;;  %v447_v16 = vld [vmem:[%s2231_s2 + $0x40] sm:$0xff]  ;;  %1555 = vmatpush3.bf16.msra.mxu1 %v1552_v22 }
  0x17   : > { %1533 = vmatprep.subr.bf16.mxu0 %v1532_v3  ;;  %v1544_v15 = vpack.c.bf16 %v446_v13, %v445_v12  ;;  %1557 = vmatprep.subr.bf16.mxu1 %v1556_v25  ;;  %v1362_v52 = vld [vmem:[%s2221_s5] ss:$0 sm:$0xff]  ;;  %v790_v1 = vld [vmem:[%s2223_s7 + $0x10] sm:$0xff]  ;;  %v791_v2 = vld [vmem:[%s2223_s7 + $0x18] sm:$0xff]  ;;  %s916_s15 = ssub.s32 (%p1964_p4), 7, %s1978_s28 }
  0x18   : > { %1535 = vmatpush3.bf16.msra.mxu0 %v1532_v3  ;;  %s1354_s26 = sshll.u32 %s1991_s19, 3  ;;  %v1576_v3 = vpack.c.bf16 %v791_v2, %v790_v1  ;;  %v1371_v20 = vld [vmem:[%s2224_s8] ss:$0 sm:$0xff]  ;;  %p917_p8 = scmp.lt.s32.totalorder (%p1964_p4), %s916_s15, 4 }
  0x19   : > { %1537 = vmatprep.subr.bf16.mxu0 %v1536_v5  ;;  %s405_s18 = scalar_lea.vmem %s2232_s0, %s1354_s26  ;;  %s419_s11 = scalar_lea.vmem %s2233_s1, %s1354_s26 }
  0x1a   : > { %v435_v14 = vld [vmem:[%s405_s18] sm:$0xff]  ;;  %v436_v17 = vld [vmem:[%s405_s18 + $0x8] sm:$0xff]  ;;  %v437_v18 = vld [vmem:[%s405_s18 + $0x10] sm:$0xff] }
  0x1b   : > { %1474 = vmatprep.mubr.msk.f32.mxu0 %vm455_vm0, %v435_v14  ;;  %v438_v19 = vld [vmem:[%s405_s18 + $0x18] sm:$0xff]  ;;  %v684_v4 = vld [vmem:[%s419_s11 + $0x8] sm:$0xff]  ;;  %s1408_s18 = sshll.u32 (%p1964_p4), %s1952_s16, 5 }
  0x1c   : > { %1539 = vmatpush3.bf16.msra.mxu0 %v1536_v5  ;;  %v683_v5 = vld [vmem:[%s419_s11] sm:$0xff]  ;;  %v686_v10 = vld [vmem:[%s419_s11 + $0x18] sm:$0xff]  ;;  %s2121_s24 = scalar_lea.vmem (%p1964_p4), %s2225_s9, %s1408_s18  }
  0x1d   : > { %1541 = vmatprep.subr.bf16.mxu0 %v1540_v11 }
  0x20   : > { %1543 = vmatpush3.bf16.msra.mxu0 %v1540_v11  ;;  %v685_v11 = vld [vmem:[%s419_s11 + $0x10] sm:$0xff] }
  0x21   : > { %1545 = vmatprep.subr.bf16.mxu0 %v1544_v15 }
  0x24   : > { %1547 = vmatpush3.bf16.msra.mxu0 %v1544_v15 }
  0x25   : > { %1472 = vmatprep.subr.mxu0 %v447_v16 }
  0x28   : > { %1473 = vmatpush3.msra.mxu0 %v447_v16 }
  0x29   : > { %1475 = vmatmul.mubr.msk.f32.vlgmr.msra.gmra.mrb[0].mxu0 %vm455_vm0, %v436_v17  ;;  %1573 = vmatprep.subr.bf16.mxu0 %v1572_v51 }
  0x2a   : > { %1477 = vmatprep.mubr.msk.f32.mxu0 %vm455_vm0, %v437_v18  ;;  %1575 = vmatpush3.bf16.msra.mxu0 %v1572_v51 }
  0x2b   : > { %1577 = vmatprep.subr.bf16.mxu0 %v1576_v3 }
  0x2d   : > { %1478 = vmatmul.mubr.msk.f32.gmra.mrb[2].mxu0 %vm455_vm0, %v438_v19 }
  0x2e   : > { %1579 = vmatpush3.bf16.msra.mxu0 %v1576_v3 }
  0xfc   : > { %v1476_v27 = vpop.f32.mrb[0].mxu0 }
  0xfd   : > { %v540_v28 = vadd.f32 %v1476_v27, %v1357_v26  ;;  %v534_v29 = vpop.f32.mrb[1].mxu0 }
  0xfe   : > { %v535_v30 = vadd.f32 %v1357_v26, %v534_v29 }
  0xff   : > { %v554_v35 = vmax.f32 %v540_v28, 0.0 }
 0x100   : > { %v553_v33 = vmax.f32 %v535_v30, 0.0  ;;  %v1479_v34 = vpop.f32.mrb[2].mxu0 }
 0x101   : > { %v550_v36 = vadd.f32 %v1479_v34, %v1357_v26  ;;  %v544_v37 = vpop.f32.mrb[3].mxu0 }
 0x102   : > { %v545_v39 = vadd.f32 %v1357_v26, %v544_v37  ;;  %1488 = vmatprep.mubr.msk.f32.mxu1 %vm568_vm1, %v553_v33 }
 0x103   : > { %1489 = vmatmul.mubr.msk.f32.vlgmr.msra.gmra.mrb[0].mxu1 %vm568_vm1, %v554_v35  ;;  %v556_v43 = vmax.f32 %v550_v36, 0.0 }
 0x104   : > { %v555_v42 = vmax.f32 %v545_v39, 0.0  ;;  %1559 = vmatpush3.bf16.msra.mxu1 %v1556_v25 }
 0x105   : > { %1561 = vmatprep.subr.bf16.mxu1 %v1560_v38 }
 0x106   : > { %1491 = vmatprep.mubr.msk.f32.mxu1 %vm568_vm1, %v555_v42 }
 0x107   : > { %1492 = vmatmul.mubr.msk.f32.gmra.mrb[2].mxu1 %vm568_vm1, %v556_v43 }
 0x108   : > { %1563 = vmatpush3.bf16.msra.mxu1 %v1560_v38 }
 0x109   : > { %1565 = vmatprep.subr.bf16.mxu1 %v1564_v44 }
 0x10c   : > { %1567 = vmatpush3.bf16.msra.mxu1 %v1564_v44 }
 0x10d   : > { %1569 = vmatprep.subr.bf16.mxu1 %v1568_v47 }
 0x110   : > { %1571 = vmatpush3.bf16.msra.mxu1 %v1568_v47 }
 0x111   : > { %1510 = vmatprep.subr.mxu1 %v682_v48 }
 0x114   : > { %1511 = vmatpush3.msra.mxu1 %v682_v48 }
 0x1d6   : > { %v1490_v53 = vpop.f32.mrb[0].mxu1 }
 0x1d7   : > { %v653_v54 = vadd.f32 %v1490_v53, %v1362_v52  ;;  %v647_v55 = vpop.f32.mrb[1].mxu1 }
 0x1d8   : > { %v648_v56 = vadd.f32 %v1362_v52, %v647_v55 }
 0x1d9   : > { %v667_v57 = vmax.f32 %v653_v54, 0.0 }
 0x1da   : > { %v666_v58 = vmax.f32 %v648_v56, 0.0  ;;  %v1493_v59 = vpop.f32.mrb[2].mxu1 }
 0x1db   : > { %671 = vst.msk [vmem:[%s2071_s23 + $0x8] sm:$0xff] %vm455_vm0, %v667_v57  ;;  %v663_v60 = vadd.f32 %v1493_v59, %v1362_v52  ;;  %v657_v61 = vpop.f32.mrb[3].mxu1 }
 0x1dc   : > { %670 = vst.msk [vmem:[%s2071_s23] sm:$0xff] %vm455_vm0, %v666_v58  ;;  %v658_v62 = vadd.f32 %v1362_v52, %v657_v61  ;;  %1512 = vmatprep.mubr.msk.f32.mxu1 %vm455_vm0, %v666_v58 }
 0x1dd   : > { %v669_v63 = vmax.f32 %v663_v60, 0.0  ;;  %1513 = vmatmul.mubr.msk.f32.vlgmr.msra.gmra.mrb[4].mxu1 %vm455_vm0, %v667_v57 }
 0x1de   : > { %v668_v0 = vmax.f32 %v658_v62, 0.0 }
 0x1df   : > { %673 = vst.msk [vmem:[%s2071_s23 + $0x18] sm:$0xff] %vm455_vm0, %v669_v63 }
 0x1e0   : > { %672 = vst.msk [vmem:[%s2071_s23 + $0x10] sm:$0xff] %vm455_vm0, %v668_v0  ;;  %1515 = vmatprep.mubr.msk.f32.mxu1 %vm455_vm0, %v668_v0 }
 0x1e1   : > { %1516 = vmatmul.mubr.msk.f32.gmra.mrb[6].mxu1 %vm455_vm0, %v669_v63 }
 0x2b0   : > { %v1514_v6 = vpop.f32.mrb[4].mxu1 }
 0x2b1   : > { %v771_v7 = vadd.f32 %v1514_v6, %v684_v4  ;;  %v765_v8 = vpop.f32.mrb[5].mxu1 }
 0x2b2   : > { %v766_v9 = vadd.f32 %v765_v8, %v683_v5 }
 0x2b3   : > { %v785_v14 = vmax.f32 %v771_v7, 0.0 }
 0x2b4   : > { %v784_v12 = vmax.f32 %v766_v9, 0.0  ;;  %v1517_v13 = vpop.f32.mrb[6].mxu1 }
 0x2b5   : > { %v781_v15 = vadd.f32 %v1517_v13, %v686_v10  ;;  %v775_v16 = vpop.f32.mrb[7].mxu1 }
 0x2b6   : > { %v776_v17 = vadd.f32 %v775_v16, %v685_v11  ;;  %1526 = vmatprep.mubr.msk.f32.mxu0 %vm568_vm1, %v784_v12 }
 0x2b7   : > { %1527 = vmatmul.mubr.msk.f32.vlgmr.msra.gmra.mrb[4].mxu0 %vm568_vm1, %v785_v14  ;;  %v787_v19 = vmax.f32 %v781_v15, 0.0 }
 0x2b8   : > { %v786_v18 = vmax.f32 %v776_v17, 0.0 }
 0x2ba   : > { %1529 = vmatprep.mubr.msk.f32.mxu0 %vm568_vm1, %v786_v18 }
 0x2bb   : > { %1530 = vmatmul.mubr.msk.f32.gmra.mrb[6].mxu0 %vm568_vm1, %v787_v19 }
 0x38a   : > { %v1528_v21 = vpop.f32.mrb[4].mxu0 }
 0x38b   : > { %v883_v22 = vadd.f32 %v1528_v21, %v1371_v20  ;;  %v877_v23 = vpop.f32.mrb[5].mxu0 }
 0x38c   : > { %v878_v24 = vadd.f32 %v1371_v20, %v877_v23 }
 0x38d   : > { %v897_v25 = vmax.f32 %v883_v22, 0.0 }
 0x38e   : > { %v896_v26 = vmax.f32 %v878_v24, 0.0  ;;  %v1531_v27 = vpop.f32.mrb[6].mxu0  ;;  %914 = sbr.rel (!%p1964_p4) target bundleno = 966 (0x3c6), region = 60 }
 0x38f   : > { %901 = vst.msk [vmem:[%s2104_s12 + $0x8] sm:$0xff] %vm568_vm1, %v897_v25  ;;  %v893_v28 = vadd.f32 %v1531_v27, %v1371_v20  ;;  %v887_v29 = vpop.f32.mrb[7].mxu0 }
 0x390   : > { %900 = vst.msk [vmem:[%s2104_s12] sm:$0xff] %vm568_vm1, %v896_v26  ;;  %v888_v30 = vadd.f32 %v1371_v20, %v887_v29 }
 0x391   : > { %v899_v31 = vmax.f32 %v893_v28, 0.0 }
 0x392   : > { %v898_v32 = vmax.f32 %v888_v30, 0.0 }
 0x393   : > { %903 = vst.msk [vmem:[%s2104_s12 + $0x18] sm:$0xff] %vm568_vm1, %v899_v31 }
 0x394   : > { %902 = vst.msk [vmem:[%s2104_s12 + $0x10] sm:$0xff] %vm568_vm1, %v898_v32 }
 0x395   : > { %s2244_s15 = smov (!%p917_p8, %s916_s15), 4 }
 0x396   : > { %s1379_s25 = sshll.u32 %s2244_s15, 7 }
 0x397   : > { %p1382_p9 = scmp.eq.s32.totalorder %s1379_s25, 0 }
 0x398   : > { %s2127_s27 = sshrl.u32 (!%p1382_p9), %s2244_s15, 2 }
 0x399   : > { %925 = sbr.rel (%p1382_p9) target bundleno = 966 (0x3c6), region = 64  ;;  %p1383_p10 = scmp.le.s32.totalorder (!%p1382_p9), %s2127_s27, 0 }
 0x3a0   : > { %1260 = sbr.rel (%p1383_p10) target bundleno = 945 (0x3b1), region = 215  ;;  %s2234_s29 = smov (!%p1383_p10), %s2121_s24 }
 0x3a1   : > { %s2235_s30 = smov (!%p1383_p10), %s2071_s23  ;;  %s2136_s11 = smov (!%p1383_p10), 0  }
 0x3a2   : > { %s1832_s19 = smov (!%p1383_p10), 0  }
 0x3a7 LB: >> { %v993_v33 = vld [vmem:[%s1826_s30] sm:$0xff]  ;;  %v995_v34 = vld [vmem:[%s1826_s30 + $0x8] sm:$0xff]  ;;  %v997_v35 = vld [vmem:[%s1826_s30 + $0x10] sm:$0xff]  ;;  %s1001_s26 = sadd.s32 1, %s1830_s11  ;;  %s987_s19 = sadd.s32 1, %s1834_s19   ;;  %s1834_s19 = sphi %s1832_s19, %s987_s19   ;;  %s1830_s11 = sphi %s2136_s11, %s2236_s11   ;;  %s1826_s30 = sphi %s2235_s30, %s1006_s30   ;;  %s1822_s29 = sphi %s2234_s29, %s1007_s29  }
 0x3a8   : >> { %994 = vst [vmem:[%s1822_s29] sm:$0xff] %v993_v33  ;;  %996 = vst [vmem:[%s1822_s29 + $0x8] sm:$0xff] %v995_v34  ;;  %v999_v36 = vld [vmem:[%s1826_s30 + $0x18] sm:$0xff]  ;;  %p1002_p11 = scmp.ge.s32.totalorder %s1001_s26, %s2127_s27  ;;  %p986_p12 = scmp.ge.s32.totalorder %s987_s19, %s2127_s27 }
 0x3a9   : >> { %998 = vst [vmem:[%s1822_s29 + $0x10] sm:$0xff] %v997_v35  ;;  %1000 = vst [vmem:[%s1822_s29 + $0x18] sm:$0xff] %v999_v36 }
 0x3aa   : >> { %s2246_s26 = smov (%p1002_p11, %s1001_s26), 0  ;;  %989 = sbr.rel (!%p986_p12) target bundleno = 935 (0x3a7), region = 221 }
 0x3ab   : >> { %s1384_s18 = sshll.u32 %s2246_s26, 5  ;;  %s2236_s11 = smov %s2246_s26 }
 0x3ac   : >> { %s1006_s30 = scalar_lea.vmem %s2071_s23, %s1384_s18 [#allocation2]   ;;  %s1007_s29 = scalar_lea.vmem %s2121_s24, %s1384_s18  }
 0x3b1 PF: > { %s2152_s22 = sand.u32 3, %s2244_s15   ;;  %s1409_s13 = sshll.u32 %s2127_s27, 5 }
 0x3b2   : > { %s1012_s25 = scalar_lea.vmem %s2071_s23, %s1409_s13 [#allocation2]   ;;  %s1014_s11 = scalar_lea.vmem %s2121_s24, %s1409_s13  }
 0x3b3   : > { %p1389_p13 = scmp.le.s32.totalorder %s2152_s22, 0 }
 0x3b4   : > { %s1836_s18 = smov (!%p1389_p13), %s1014_s11   ;;  %s1840_s0 = smov (!%p1389_p13), %s1012_s25  }
 0x3b5   : > { %1274 = sbr.rel (%p1389_p13) target bundleno = 966 (0x3c6), region = 226  ;;  %s1844_s1 = smov (!%p1389_p13), 0  }
 0x3b6   : > { %s1848_s2 = smov (!%p1389_p13), 0  }
 0x3bc LB: >> { %v1024_v37 = vld [vmem:[%s1842_s0] sm:$0xff]  ;;  %s1026_s15 = sadd.s32 1, %s1846_s1  ;;  %s1018_s2 = sadd.s32 1, %s1850_s2   ;;  %s1850_s2 = sphi %s1848_s2, %s1018_s2   ;;  %s1846_s1 = sphi %s1844_s1, %s1845_s1   ;;  %s1842_s0 = sphi %s1840_s0, %s1031_s0   ;;  %s1838_s18 = sphi %s1836_s18, %s1032_s18  }
 0x3bd   : >> { %1025 = vst [vmem:[%s1838_s18] sm:$0xff] %v1024_v37  ;;  %p1027_p0 = scmp.ge.s32.totalorder %s1026_s15, %s2152_s22  ;;  %p1017_p1 = scmp.ge.s32.totalorder %s1018_s2, %s2152_s22 }
 0x3bf   : >> { %s2248_s15 = smov (%p1027_p0, %s1026_s15), 0  ;;  %1020 = sbr.rel (!%p1017_p1) target bundleno = 956 (0x3bc), region = 232 }
 0x3c0   : >> { %s1390_s23 = sshll.u32 %s2248_s15, 3  ;;  %s1845_s1 = smov %s2248_s15  }
 0x3c1   : >> { %s1031_s0 = scalar_lea.vmem %s1012_s25, %s1390_s23 [#allocation2]   ;;  %s1032_s18 = scalar_lea.vmem %s1014_s11, %s1390_s23  }
 0x3c6 PF: > { %1038 = sbr.rel (!%p1964_p4) target bundleno = 1022 (0x3fe), region = 112  ;;  %s1040_s1 = ssub.s32 (%p1964_p4), 7, %s1978_s28 }
 0x3c7   : > { %s1411_s24 = sshll.u32 (%p1964_p4), %s1952_s16, 5  ;;  %p1041_p2 = scmp.lt.s32.totalorder (%p1964_p4), %s1040_s1, 4 }
 0x3c8   : > { %s2167_s30 = scalar_lea.vmem (%p1964_p4), %s2226_s10, %s1411_s24  }
 0x3cd   : > { %s2250_s1 = smov (!%p1041_p2, %s1040_s1), 4 }
 0x3ce   : > { %s1393_s0 = sshll.u32 %s2250_s1, 7 }
 0x3cf   : > { %p1396_p3 = scmp.eq.s32.totalorder %s1393_s0, 0 }
 0x3d0   : > { %s2173_s2 = sshrl.u32 (!%p1396_p3), %s2250_s1, 2 }
 0x3d1   : > { %1049 = sbr.rel (%p1396_p3) target bundleno = 1022 (0x3fe), region = 116  ;;  %p1397_p4 = scmp.le.s32.totalorder (!%p1396_p3), %s2173_s2, 0 }
 0x3d8   : > { %1288 = sbr.rel (%p1397_p4) target bundleno = 1001 (0x3e9), region = 237  ;;  %s2237_s16 = smov (!%p1397_p4), %s2167_s30 }
 0x3d9   : > { %s2238_s21 = smov (!%p1397_p4), %s2104_s12  ;;  %s2182_s28 = smov (!%p1397_p4), 0  }
 0x3da   : > { %s1864_s19 = smov (!%p1397_p4), 0  }
 0x3df LB: >> { %v1117_v38 = vld [vmem:[%s1858_s21] sm:$0xff]  ;;  %v1119_v39 = vld [vmem:[%s1858_s21 + $0x8] sm:$0xff]  ;;  %v1121_v40 = vld [vmem:[%s1858_s21 + $0x10] sm:$0xff]  ;;  %s1125_s26 = sadd.s32 1, %s1862_s28  ;;  %s1111_s19 = sadd.s32 1, %s1866_s19   ;;  %s1866_s19 = sphi %s1864_s19, %s1111_s19   ;;  %s1862_s28 = sphi %s2182_s28, %s2239_s28   ;;  %s1858_s21 = sphi %s2238_s21, %s1130_s21   ;;  %s1854_s16 = sphi %s2237_s16, %s1131_s16  }
 0x3e0   : >> { %1118 = vst [vmem:[%s1854_s16] sm:$0xff] %v1117_v38  ;;  %1120 = vst [vmem:[%s1854_s16 + $0x8] sm:$0xff] %v1119_v39  ;;  %v1123_v41 = vld [vmem:[%s1858_s21 + $0x18] sm:$0xff]  ;;  %p1126_p5 = scmp.ge.s32.totalorder %s1125_s26, %s2173_s2  ;;  %p1110_p6 = scmp.ge.s32.totalorder %s1111_s19, %s2173_s2 }
 0x3e1   : >> { %1122 = vst [vmem:[%s1854_s16 + $0x10] sm:$0xff] %v1121_v40  ;;  %1124 = vst [vmem:[%s1854_s16 + $0x18] sm:$0xff] %v1123_v41 }
 0x3e2   : >> { %s2252_s26 = smov (%p1126_p5, %s1125_s26), 0  ;;  %1113 = sbr.rel (!%p1110_p6) target bundleno = 991 (0x3df), region = 243 }
 0x3e3   : >> { %s1398_s22 = sshll.u32 %s2252_s26, 5  ;;  %s2239_s28 = smov %s2252_s26 }
 0x3e4   : >> { %s1130_s21 = scalar_lea.vmem %s2104_s12, %s1398_s22 [#allocation3]   ;;  %s1131_s16 = scalar_lea.vmem %s2167_s30, %s1398_s22  }
 0x3e9 PF: > { %s2198_s13 = sand.u32 3, %s2250_s1   ;;  %s1412_s25 = sshll.u32 %s2173_s2, 5 }
 0x3ea   : > { %s1136_s11 = scalar_lea.vmem %s2104_s12, %s1412_s25 [#allocation3]   ;;  %s1138_s18 = scalar_lea.vmem %s2167_s30, %s1412_s25  }
 0x3eb   : > { %p1403_p7 = scmp.le.s32.totalorder %s2198_s13, 0 }
 0x3ec   : > { %s1868_s15 = smov (!%p1403_p7), %s1138_s18   ;;  %s1872_s23 = smov (!%p1403_p7), %s1136_s11  }
 0x3ed   : > { %1302 = sbr.rel (%p1403_p7) target bundleno = 1022 (0x3fe), region = 248  ;;  %s1876_s24 = smov (!%p1403_p7), 0  }
 0x3ee   : > { %s1880_s27 = smov (!%p1403_p7), 0  }
 0x3f4 LB: >> { %v1148_v42 = vld [vmem:[%s1874_s23] sm:$0xff]  ;;  %s1150_s1 = sadd.s32 1, %s1878_s24  ;;  %s1142_s27 = sadd.s32 1, %s1882_s27   ;;  %s1882_s27 = sphi %s1880_s27, %s1142_s27   ;;  %s1878_s24 = sphi %s1876_s24, %s1877_s24   ;;  %s1874_s23 = sphi %s1872_s23, %s1155_s23   ;;  %s1870_s15 = sphi %s1868_s15, %s1156_s15  }
 0x3f5   : >> { %1149 = vst [vmem:[%s1870_s15] sm:$0xff] %v1148_v42  ;;  %p1151_p8 = scmp.ge.s32.totalorder %s1150_s1, %s2198_s13  ;;  %p1141_p9 = scmp.ge.s32.totalorder %s1142_s27, %s2198_s13 }
 0x3f7   : >> { %s2254_s1 = smov (%p1151_p8, %s1150_s1), 0  ;;  %1144 = sbr.rel (!%p1141_p9) target bundleno = 1012 (0x3f4), region = 254 }
 0x3f8   : >> { %s1404_s12 = sshll.u32 %s2254_s1, 3  ;;  %s1877_s24 = smov %s2254_s1  }
 0x3f9   : >> { %s1155_s23 = scalar_lea.vmem %s1136_s11, %s1404_s12 [#allocation3]   ;;  %s1156_s15 = scalar_lea.vmem %s1138_s18, %s1404_s12  }
 0x3fe PF: > { %p18_p10 = scmp.ge.s32.totalorder %s1954_s17, 4   ;;  %s2240_s13 = smov %s1814_s14 }
 0x3ff   : > { %s2241_s14 = smov %s1962_s20  ;;  %s2242_s15 = smov %s1954_s17 }
 0x400   :  { %20 = sbr.rel (!%p18_p10) target bundleno = 6 (0x6), region = 265 }

</bundles_post_ra>
